<compile_context>
chip_gen: v7x
topology: tpu7x:2x2x1
jax: 0.10.0
libtpu: 0.0.40
codegen_flags: <defaults>
</compile_context>

<pallas_src>
import numpy as np

import jax
import jax.numpy as jnp
from jax import lax
from jax.experimental import pallas as pl
from jax.experimental.pallas import tpu as pltpu


# ---------------------------------------------------------------------------
# Geometry (16x16 input, 3x3 convs, pad 1)
# ---------------------------------------------------------------------------
_H = 16
_W = 16
_WP = _W + 4                      # padded canvas width  (pad = 2 each side)
_HP = _H + 4                      # padded canvas height
_CANVAS = _HP * _WP               # 400 flattened canvas positions
_L1 = _CANVAS - (2 * _WP + 2)     # 358: conv1 canvas-output slice length
_L2 = (_H - 1) * _WP + _W         # 316: conv2 canvas-output slice length


# ---------------------------------------------------------------------------
# Fused kernel: conv1 -> conv2 -> (stride-2 + mean pool) -> enc FC -> MLP
# ---------------------------------------------------------------------------
def _bc_fused_kernel(x_ref, w1t_ref, b1_ref, w2t_ref, b2_ref,
                     wenc_ref, benc_ref, wp1_ref, bp1_ref, wp2_ref, bp2_ref,
                     mask1_ref, maskp_ref, o_ref):
    x = x_ref[0]                                            # [4, 400] flattened padded canvas

    # ---- conv1 (3x3, s1, p1): 9 shifted-window matmuls, lane-dense [8, 358]
    acc1 = jnp.zeros((8, _L1), jnp.float32)
    for di in range(3):
        for dj in range(3):
            off = di * _WP + dj
            acc1 = acc1 + jnp.dot(w1t_ref[di * 3 + dj], x[:, off:off + _L1],
                                  preferred_element_type=jnp.float32)
    # bias + ReLU; zero the 1-px canvas border == the zero padding conv2 needs
    h1p = jnp.maximum(acc1 + b1_ref[...], 0.0) * mask1_ref[...]

    # ---- conv2 (3x3, p1) evaluated at stride 1; the stride-2 selection is
    #      folded into the pooling mask below.  lane-dense [16, 316]
    acc2 = jnp.zeros((16, _L2), jnp.float32)
    for di in range(3):
        for dj in range(3):
            off = di * _WP + dj
            acc2 = acc2 + jnp.dot(w2t_ref[di * 3 + dj], h1p[:, off:off + _L2],
                                  preferred_element_type=jnp.float32)
    f_act = jnp.maximum(acc2 + b2_ref[...], 0.0)            # [16, 316]

    # ---- stride-2 downsample + global average pool as one masked reduction
    pooled = jnp.sum(f_act * maskp_ref[...], axis=1, keepdims=True)   # [16, 1]

    # ---- encoder FC + predictor MLP (column form, stays in vregs)
    rep = jnp.maximum(
        jnp.dot(wenc_ref[...], pooled, preferred_element_type=jnp.float32)
        + benc_ref[...], 0.0)                               # [32, 1]
    hid = jnp.maximum(
        jnp.dot(wp1_ref[...], rep, preferred_element_type=jnp.float32)
        + bp1_ref[...], 0.0)                                # [32, 1]
    act = (jnp.dot(wp2_ref[...], hid, preferred_element_type=jnp.float32)
           + bp2_ref[...])                                  # [8, 1]
    o_ref[...] = act.reshape(1, 8, 1)


# ---------------------------------------------------------------------------
# Constant masks (trace-time numpy constants)
# ---------------------------------------------------------------------------
def _pool_masks():
    # mask1: keep only the interior of the conv1 canvas (rows/cols 1..16);
    # the zeroed border is exactly conv2's zero padding.
    p1 = np.arange(_L1)
    r1, s1 = p1 // _WP, p1 % _WP
    mask1 = ((r1 >= 1) & (r1 <= _H) & (s1 >= 1) & (s1 <= _W))
    mask1 = mask1.astype(np.float32)[None, :]                       # [1, 358]
    # maskp: select the stride-2 output centers (even rows/cols < 16) and fold
    # in the 1/64 global-average-pool factor.
    p2 = np.arange(_L2)
    r2, s2 = p2 // _WP, p2 % _WP
    sel = (r2 < _H) & (s2 < _W) & (r2 % 2 == 0) & (s2 % 2 == 0)
    maskp = (sel.astype(np.float32) / float((_H // 2) * (_W // 2)))[None, :]  # [1, 316]
    return jnp.asarray(mask1), jnp.asarray(maskp)


# ---------------------------------------------------------------------------
# Public forward: action = predictor(encoder(x)),  x is NCHW [B, 4, 16, 16]
# ---------------------------------------------------------------------------
def behavior_cloning_forward(params, x_nchw):
    B, C, H, W = x_nchw.shape
    assert (C, H, W) == (4, _H, _W)
    x = x_nchw.astype(jnp.float32)
    xp = jnp.pad(x, ((0, 0), (0, 0), (2, 2), (2, 2)))        # [B, 4, 20, 20]
    xf = xp.reshape(B, C, _CANVAS)                           # [B, 4, 400]

    # Weight layout plumbing (tiny, fused by XLA): per-tap transposed matrices
    # so every GEMM is [Cout, Cin] @ [Cin, spatial] with a lane-dense result.
    w1t = jnp.transpose(params["conv1_w"], (2, 3, 0, 1)).reshape(9, 8, 4)
    w2t = jnp.transpose(params["conv2_w"], (2, 3, 0, 1)).reshape(9, 16, 8)
    b1 = params["conv1_b"].reshape(8, 1)
    b2 = params["conv2_b"].reshape(16, 1)
    wenc = jnp.transpose(params["enc_fc_w"])                 # [32, 16]
    benc = params["enc_fc_b"].reshape(32, 1)
    wp1 = jnp.transpose(params["pred_fc1_w"])                # [32, 32]
    bp1 = params["pred_fc1_b"].reshape(32, 1)
    wp2 = jnp.transpose(params["pred_fc2_w"])                # [8, 32]
    bp2 = params["pred_fc2_b"].reshape(8, 1)
    mask1, maskp = _pool_masks()

    flops = 2 * B * (9 * 4 * 8 * _L1 + 9 * 8 * 16 * _L2 + 16 * _L2
                     + 32 * 16 + 32 * 32 + 8 * 32)
    bytes_accessed = int(xf.size * 4 + 20_000 + B * 8 * 4)

    out = pl.pallas_call(
        _bc_fused_kernel,
        out_shape=jax.ShapeDtypeStruct((B, 8, 1), jnp.float32),
        grid=(B,),
        in_specs=[
            pl.BlockSpec((1, 4, _CANVAS), lambda b: (b, 0, 0)),   # x canvas
            pl.BlockSpec((9, 8, 4), lambda b: (0, 0, 0)),         # conv1 taps
            pl.BlockSpec((8, 1), lambda b: (0, 0)),               # conv1 bias
            pl.BlockSpec((9, 16, 8), lambda b: (0, 0, 0)),        # conv2 taps
            pl.BlockSpec((16, 1), lambda b: (0, 0)),              # conv2 bias
            pl.BlockSpec((32, 16), lambda b: (0, 0)),             # enc_fc W^T
            pl.BlockSpec((32, 1), lambda b: (0, 0)),              # enc_fc b
            pl.BlockSpec((32, 32), lambda b: (0, 0)),             # pred_fc1 W^T
            pl.BlockSpec((32, 1), lambda b: (0, 0)),              # pred_fc1 b
            pl.BlockSpec((8, 32), lambda b: (0, 0)),              # pred_fc2 W^T
            pl.BlockSpec((8, 1), lambda b: (0, 0)),               # pred_fc2 b
            pl.BlockSpec((1, _L1), lambda b: (0, 0)),             # border mask
            pl.BlockSpec((1, _L2), lambda b: (0, 0)),             # pool mask
        ],
        out_specs=pl.BlockSpec((1, 8, 1), lambda b: (b, 0, 0)),
        compiler_params=pltpu.CompilerParams(
            dimension_semantics=("parallel",),
            vmem_limit_bytes=16 * 1024 * 1024),
        cost_estimate=pl.CostEstimate(flops=flops, transcendentals=0,
                                      bytes_accessed=bytes_accessed),
    )(xf, w1t, b1, w2t, b2, wenc, benc, wp1, bp1, wp2, bp2, mask1, maskp)
    return out[:, :, 0]                                      # [B, 8]


# ---------------------------------------------------------------------------
# Deterministic parameter init (PyTorch layouts: conv [Cout,Cin,kh,kw])
# ---------------------------------------------------------------------------
def init_params(key):
    ks = jax.random.split(key, 10)

    def w(k, shape, fan_in):
        return (jax.random.normal(k, shape, jnp.float32) / jnp.sqrt(fan_in)).astype(
            jnp.float32
        )

    return {
        "conv1_w": w(ks[0], (8, 4, 3, 3), 4 * 3 * 3),
        "conv1_b": w(ks[1], (8,), 4 * 3 * 3),
        "conv2_w": w(ks[2], (16, 8, 3, 3), 8 * 3 * 3),
        "conv2_b": w(ks[3], (16,), 8 * 3 * 3),
        "enc_fc_w": w(ks[4], (16, 32), 16),
        "enc_fc_b": w(ks[5], (32,), 16),
        "pred_fc1_w": w(ks[6], (32, 32), 32),
        "pred_fc1_b": w(ks[7], (32,), 32),
        "pred_fc2_w": w(ks[8], (32, 8), 32),
        "pred_fc2_b": w(ks[9], (8,), 32),
    }


# ---------------------------------------------------------------------------
# Pure-JAX reference (same math, XLA convs) for a correctness check
# ---------------------------------------------------------------------------
def reference_forward(params, x_nchw):
    hp = lax.Precision.HIGHEST
    h = lax.conv_general_dilated(
        x_nchw, params["conv1_w"], window_strides=(1, 1),
        padding=[(1, 1), (1, 1)],
        dimension_numbers=("NCHW", "OIHW", "NCHW"), precision=hp)
    h = jnp.maximum(h + params["conv1_b"][None, :, None, None], 0.0)
    h = lax.conv_general_dilated(
        h, params["conv2_w"], window_strides=(2, 2),
        padding=[(1, 1), (1, 1)],
        dimension_numbers=("NCHW", "OIHW", "NCHW"), precision=hp)
    h = jnp.maximum(h + params["conv2_b"][None, :, None, None], 0.0)
    pooled = jnp.mean(h, axis=(2, 3))                                    # [B, 16]
    rep = jnp.maximum(jnp.dot(pooled, params["enc_fc_w"], precision=hp)
                      + params["enc_fc_b"], 0.0)
    hid = jnp.maximum(jnp.dot(rep, params["pred_fc1_w"], precision=hp)
                      + params["pred_fc1_b"], 0.0)
    return jnp.dot(hid, params["pred_fc2_w"], precision=hp) + params["pred_fc2_b"]


if __name__ == "__main__":
    key = jax.random.PRNGKey(0)
    pkey, xkey = jax.random.split(key)
    params = init_params(pkey)

    # input_data: [batch=2, channels=4, H=16, W=16]  (NCHW, PyTorch convention)
    x = jax.random.normal(xkey, (2, 4, 16, 16), jnp.float32)

    action = jax.jit(behavior_cloning_forward)(params, x)
    jax.block_until_ready(action)
    assert action.shape == (2, 8) and action.dtype == jnp.float32

    expected = jax.jit(reference_forward)(params, x)
    jax.block_until_ready(expected)
    max_err = float(jnp.max(jnp.abs(action - expected)))
    assert max_err < 1e-3, f"kernel/reference mismatch: {max_err}"

    print("KERNEL_OK")
</pallas_src>

<mosaic_0001>
module attributes {stable_mosaic.version = 11 : i64} {
  func.func @_bc_fused_kernel(%arg0: i32, %arg1: memref<1x4x400xf32, #tpu.memory_space<vmem>>, %arg2: memref<9x8x4xf32, #tpu.memory_space<vmem>>, %arg3: memref<8x1xf32, #tpu.memory_space<vmem>>, %arg4: memref<9x16x8xf32, #tpu.memory_space<vmem>>, %arg5: memref<16x1xf32, #tpu.memory_space<vmem>>, %arg6: memref<32x16xf32, #tpu.memory_space<vmem>>, %arg7: memref<32x1xf32, #tpu.memory_space<vmem>>, %arg8: memref<32x32xf32, #tpu.memory_space<vmem>>, %arg9: memref<32x1xf32, #tpu.memory_space<vmem>>, %arg10: memref<8x32xf32, #tpu.memory_space<vmem>>, %arg11: memref<8x1xf32, #tpu.memory_space<vmem>>, %arg12: memref<1x358xf32, #tpu.memory_space<vmem>>, %arg13: memref<1x316xf32, #tpu.memory_space<vmem>>, %arg14: memref<1x8x1xf32, #tpu.memory_space<vmem>>) attributes {dimension_semantics = [#tpu.dimension_semantics<parallel>], iteration_bounds = array<i64: 2>, scalar_prefetch = 0 : i64, scratch_operands = 0 : i64, tpu.core_type = #tpu.core_type<tc>, window_params = [{transform_indices = @transform_0, window_bounds = array<i64: 1, 4, 400>}, {pipeline_mode = #tpu.pipeline_mode<synchronous>, transform_indices = @transform_1, window_bounds = array<i64: 9, 8, 4>}, {pipeline_mode = #tpu.pipeline_mode<synchronous>, transform_indices = @transform_2, window_bounds = array<i64: 8, 1>}, {pipeline_mode = #tpu.pipeline_mode<synchronous>, transform_indices = @transform_3, window_bounds = array<i64: 9, 16, 8>}, {pipeline_mode = #tpu.pipeline_mode<synchronous>, transform_indices = @transform_4, window_bounds = array<i64: 16, 1>}, {pipeline_mode = #tpu.pipeline_mode<synchronous>, transform_indices = @transform_5, window_bounds = array<i64: 32, 16>}, {pipeline_mode = #tpu.pipeline_mode<synchronous>, transform_indices = @transform_6, window_bounds = array<i64: 32, 1>}, {pipeline_mode = #tpu.pipeline_mode<synchronous>, transform_indices = @transform_7, window_bounds = array<i64: 32, 32>}, {pipeline_mode = #tpu.pipeline_mode<synchronous>, transform_indices = @transform_8, window_bounds = array<i64: 32, 1>}, {pipeline_mode = #tpu.pipeline_mode<synchronous>, transform_indices = @transform_9, window_bounds = array<i64: 8, 32>}, {pipeline_mode = #tpu.pipeline_mode<synchronous>, transform_indices = @transform_10, window_bounds = array<i64: 8, 1>}, {pipeline_mode = #tpu.pipeline_mode<synchronous>, transform_indices = @transform_11, window_bounds = array<i64: 1, 358>}, {pipeline_mode = #tpu.pipeline_mode<synchronous>, transform_indices = @transform_12, window_bounds = array<i64: 1, 316>}, {transform_indices = @transform_13, window_bounds = array<i64: 1, 8, 1>}]} {
    %c0 = arith.constant 0 : index
    %c0_0 = arith.constant 0 : index
    %c0_1 = arith.constant 0 : index
    %0 = vector.load %arg1[%c0, %c0_0, %c0_1] : memref<1x4x400xf32, #tpu.memory_space<vmem>>, vector<1x4x400xf32>
    %1 = vector.shape_cast %0 : vector<1x4x400xf32> to vector<4x400xf32>
    %cst = arith.constant 0.000000e+00 : f32
    %2 = vector.broadcast %cst : f32 to vector<8x358xf32>
    %c0_2 = arith.constant 0 : index
    %c0_3 = arith.constant 0 : index
    %c0_4 = arith.constant 0 : index
    %3 = vector.load %arg2[%c0_2, %c0_3, %c0_4] : memref<9x8x4xf32, #tpu.memory_space<vmem>>, vector<1x8x4xf32>
    %4 = vector.shape_cast %3 : vector<1x8x4xf32> to vector<8x4xf32>
    %5 = vector.extract_strided_slice %1 {offsets = [0, 0], sizes = [4, 358], strides = [1, 1]} : vector<4x400xf32> to vector<4x358xf32>
    %cst_5 = arith.constant dense<0.000000e+00> : vector<8x358xf32>
    %6 = tpu.matmul %4, %5, %cst_5 {dimension_numbers = #tpu.dot_dimension_numbers<[1], [0], [0], [1], [0, 0, 1, 1], [], []>} : vector<8x4xf32>, vector<4x358xf32>, vector<8x358xf32> -> vector<8x358xf32>
    %7 = arith.addf %2, %6 : vector<8x358xf32>
    %c1 = arith.constant 1 : index
    %c0_6 = arith.constant 0 : index
    %c0_7 = arith.constant 0 : index
    %8 = vector.load %arg2[%c1, %c0_6, %c0_7] : memref<9x8x4xf32, #tpu.memory_space<vmem>>, vector<1x8x4xf32>
    %9 = vector.shape_cast %8 : vector<1x8x4xf32> to vector<8x4xf32>
    %10 = vector.extract_strided_slice %1 {offsets = [0, 1], sizes = [4, 358], strides = [1, 1]} : vector<4x400xf32> to vector<4x358xf32>
    %cst_8 = arith.constant dense<0.000000e+00> : vector<8x358xf32>
    %11 = tpu.matmul %9, %10, %cst_8 {dimension_numbers = #tpu.dot_dimension_numbers<[1], [0], [0], [1], [0, 0, 1, 1], [], []>} : vector<8x4xf32>, vector<4x358xf32>, vector<8x358xf32> -> vector<8x358xf32>
    %12 = arith.addf %7, %11 : vector<8x358xf32>
    %c2 = arith.constant 2 : index
    %c0_9 = arith.constant 0 : index
    %c0_10 = arith.constant 0 : index
    %13 = vector.load %arg2[%c2, %c0_9, %c0_10] : memref<9x8x4xf32, #tpu.memory_space<vmem>>, vector<1x8x4xf32>
    %14 = vector.shape_cast %13 : vector<1x8x4xf32> to vector<8x4xf32>
    %15 = vector.extract_strided_slice %1 {offsets = [0, 2], sizes = [4, 358], strides = [1, 1]} : vector<4x400xf32> to vector<4x358xf32>
    %cst_11 = arith.constant dense<0.000000e+00> : vector<8x358xf32>
    %16 = tpu.matmul %14, %15, %cst_11 {dimension_numbers = #tpu.dot_dimension_numbers<[1], [0], [0], [1], [0, 0, 1, 1], [], []>} : vector<8x4xf32>, vector<4x358xf32>, vector<8x358xf32> -> vector<8x358xf32>
    %17 = arith.addf %12, %16 : vector<8x358xf32>
    %c3 = arith.constant 3 : index
    %c0_12 = arith.constant 0 : index
    %c0_13 = arith.constant 0 : index
    %18 = vector.load %arg2[%c3, %c0_12, %c0_13] : memref<9x8x4xf32, #tpu.memory_space<vmem>>, vector<1x8x4xf32>
    %19 = vector.shape_cast %18 : vector<1x8x4xf32> to vector<8x4xf32>
    %20 = vector.extract_strided_slice %1 {offsets = [0, 20], sizes = [4, 358], strides = [1, 1]} : vector<4x400xf32> to vector<4x358xf32>
    %cst_14 = arith.constant dense<0.000000e+00> : vector<8x358xf32>
    %21 = tpu.matmul %19, %20, %cst_14 {dimension_numbers = #tpu.dot_dimension_numbers<[1], [0], [0], [1], [0, 0, 1, 1], [], []>} : vector<8x4xf32>, vector<4x358xf32>, vector<8x358xf32> -> vector<8x358xf32>
    %22 = arith.addf %17, %21 : vector<8x358xf32>
    %c4 = arith.constant 4 : index
    %c0_15 = arith.constant 0 : index
    %c0_16 = arith.constant 0 : index
    %23 = vector.load %arg2[%c4, %c0_15, %c0_16] : memref<9x8x4xf32, #tpu.memory_space<vmem>>, vector<1x8x4xf32>
    %24 = vector.shape_cast %23 : vector<1x8x4xf32> to vector<8x4xf32>
    %25 = vector.extract_strided_slice %1 {offsets = [0, 21], sizes = [4, 358], strides = [1, 1]} : vector<4x400xf32> to vector<4x358xf32>
    %cst_17 = arith.constant dense<0.000000e+00> : vector<8x358xf32>
    %26 = tpu.matmul %24, %25, %cst_17 {dimension_numbers = #tpu.dot_dimension_numbers<[1], [0], [0], [1], [0, 0, 1, 1], [], []>} : vector<8x4xf32>, vector<4x358xf32>, vector<8x358xf32> -> vector<8x358xf32>
    %27 = arith.addf %22, %26 : vector<8x358xf32>
    %c5 = arith.constant 5 : index
    %c0_18 = arith.constant 0 : index
    %c0_19 = arith.constant 0 : index
    %28 = vector.load %arg2[%c5, %c0_18, %c0_19] : memref<9x8x4xf32, #tpu.memory_space<vmem>>, vector<1x8x4xf32>
    %29 = vector.shape_cast %28 : vector<1x8x4xf32> to vector<8x4xf32>
    %30 = vector.extract_strided_slice %1 {offsets = [0, 22], sizes = [4, 358], strides = [1, 1]} : vector<4x400xf32> to vector<4x358xf32>
    %cst_20 = arith.constant dense<0.000000e+00> : vector<8x358xf32>
    %31 = tpu.matmul %29, %30, %cst_20 {dimension_numbers = #tpu.dot_dimension_numbers<[1], [0], [0], [1], [0, 0, 1, 1], [], []>} : vector<8x4xf32>, vector<4x358xf32>, vector<8x358xf32> -> vector<8x358xf32>
    %32 = arith.addf %27, %31 : vector<8x358xf32>
    %c6 = arith.constant 6 : index
    %c0_21 = arith.constant 0 : index
    %c0_22 = arith.constant 0 : index
    %33 = vector.load %arg2[%c6, %c0_21, %c0_22] : memref<9x8x4xf32, #tpu.memory_space<vmem>>, vector<1x8x4xf32>
    %34 = vector.shape_cast %33 : vector<1x8x4xf32> to vector<8x4xf32>
    %35 = vector.extract_strided_slice %1 {offsets = [0, 40], sizes = [4, 358], strides = [1, 1]} : vector<4x400xf32> to vector<4x358xf32>
    %cst_23 = arith.constant dense<0.000000e+00> : vector<8x358xf32>
    %36 = tpu.matmul %34, %35, %cst_23 {dimension_numbers = #tpu.dot_dimension_numbers<[1], [0], [0], [1], [0, 0, 1, 1], [], []>} : vector<8x4xf32>, vector<4x358xf32>, vector<8x358xf32> -> vector<8x358xf32>
    %37 = arith.addf %32, %36 : vector<8x358xf32>
    %c7 = arith.constant 7 : index
    %c0_24 = arith.constant 0 : index
    %c0_25 = arith.constant 0 : index
    %38 = vector.load %arg2[%c7, %c0_24, %c0_25] : memref<9x8x4xf32, #tpu.memory_space<vmem>>, vector<1x8x4xf32>
    %39 = vector.shape_cast %38 : vector<1x8x4xf32> to vector<8x4xf32>
    %40 = vector.extract_strided_slice %1 {offsets = [0, 41], sizes = [4, 358], strides = [1, 1]} : vector<4x400xf32> to vector<4x358xf32>
    %cst_26 = arith.constant dense<0.000000e+00> : vector<8x358xf32>
    %41 = tpu.matmul %39, %40, %cst_26 {dimension_numbers = #tpu.dot_dimension_numbers<[1], [0], [0], [1], [0, 0, 1, 1], [], []>} : vector<8x4xf32>, vector<4x358xf32>, vector<8x358xf32> -> vector<8x358xf32>
    %42 = arith.addf %37, %41 : vector<8x358xf32>
    %c8 = arith.constant 8 : index
    %c0_27 = arith.constant 0 : index
    %c0_28 = arith.constant 0 : index
    %43 = vector.load %arg2[%c8, %c0_27, %c0_28] : memref<9x8x4xf32, #tpu.memory_space<vmem>>, vector<1x8x4xf32>
    %44 = vector.shape_cast %43 : vector<1x8x4xf32> to vector<8x4xf32>
    %45 = vector.extract_strided_slice %1 {offsets = [0, 42], sizes = [4, 358], strides = [1, 1]} : vector<4x400xf32> to vector<4x358xf32>
    %cst_29 = arith.constant dense<0.000000e+00> : vector<8x358xf32>
    %46 = tpu.matmul %44, %45, %cst_29 {dimension_numbers = #tpu.dot_dimension_numbers<[1], [0], [0], [1], [0, 0, 1, 1], [], []>} : vector<8x4xf32>, vector<4x358xf32>, vector<8x358xf32> -> vector<8x358xf32>
    %47 = arith.addf %42, %46 : vector<8x358xf32>
    %c0_30 = arith.constant 0 : index
    %c0_31 = arith.constant 0 : index
    %48 = vector.load %arg3[%c0_30, %c0_31] : memref<8x1xf32, #tpu.memory_space<vmem>>, vector<8x1xf32>
    %49 = vector.broadcast %48 : vector<8x1xf32> to vector<8x358xf32>
    %50 = arith.addf %47, %49 : vector<8x358xf32>
    %cst_32 = arith.constant 0.000000e+00 : f32
    %51 = vector.broadcast %cst_32 : f32 to vector<8x358xf32>
    %52 = arith.maximumf %50, %51 : vector<8x358xf32>
    %c0_33 = arith.constant 0 : index
    %c0_34 = arith.constant 0 : index
    %53 = vector.load %arg12[%c0_33, %c0_34] : memref<1x358xf32, #tpu.memory_space<vmem>>, vector<1x358xf32>
    %54 = vector.broadcast %53 : vector<1x358xf32> to vector<8x358xf32>
    %55 = arith.mulf %52, %54 : vector<8x358xf32>
    %cst_35 = arith.constant 0.000000e+00 : f32
    %56 = vector.broadcast %cst_35 : f32 to vector<16x316xf32>
    %c0_36 = arith.constant 0 : index
    %c0_37 = arith.constant 0 : index
    %c0_38 = arith.constant 0 : index
    %57 = vector.load %arg4[%c0_36, %c0_37, %c0_38] : memref<9x16x8xf32, #tpu.memory_space<vmem>>, vector<1x16x8xf32>
    %58 = vector.shape_cast %57 : vector<1x16x8xf32> to vector<16x8xf32>
    %59 = vector.extract_strided_slice %55 {offsets = [0, 0], sizes = [8, 316], strides = [1, 1]} : vector<8x358xf32> to vector<8x316xf32>
    %cst_39 = arith.constant dense<0.000000e+00> : vector<16x316xf32>
    %60 = tpu.matmul %58, %59, %cst_39 {dimension_numbers = #tpu.dot_dimension_numbers<[1], [0], [0], [1], [0, 0, 1, 1], [], []>} : vector<16x8xf32>, vector<8x316xf32>, vector<16x316xf32> -> vector<16x316xf32>
    %61 = arith.addf %56, %60 : vector<16x316xf32>
    %c1_40 = arith.constant 1 : index
    %c0_41 = arith.constant 0 : index
    %c0_42 = arith.constant 0 : index
    %62 = vector.load %arg4[%c1_40, %c0_41, %c0_42] : memref<9x16x8xf32, #tpu.memory_space<vmem>>, vector<1x16x8xf32>
    %63 = vector.shape_cast %62 : vector<1x16x8xf32> to vector<16x8xf32>
    %64 = vector.extract_strided_slice %55 {offsets = [0, 1], sizes = [8, 316], strides = [1, 1]} : vector<8x358xf32> to vector<8x316xf32>
    %cst_43 = arith.constant dense<0.000000e+00> : vector<16x316xf32>
    %65 = tpu.matmul %63, %64, %cst_43 {dimension_numbers = #tpu.dot_dimension_numbers<[1], [0], [0], [1], [0, 0, 1, 1], [], []>} : vector<16x8xf32>, vector<8x316xf32>, vector<16x316xf32> -> vector<16x316xf32>
    %66 = arith.addf %61, %65 : vector<16x316xf32>
    %c2_44 = arith.constant 2 : index
    %c0_45 = arith.constant 0 : index
    %c0_46 = arith.constant 0 : index
    %67 = vector.load %arg4[%c2_44, %c0_45, %c0_46] : memref<9x16x8xf32, #tpu.memory_space<vmem>>, vector<1x16x8xf32>
    %68 = vector.shape_cast %67 : vector<1x16x8xf32> to vector<16x8xf32>
    %69 = vector.extract_strided_slice %55 {offsets = [0, 2], sizes = [8, 316], strides = [1, 1]} : vector<8x358xf32> to vector<8x316xf32>
    %cst_47 = arith.constant dense<0.000000e+00> : vector<16x316xf32>
    %70 = tpu.matmul %68, %69, %cst_47 {dimension_numbers = #tpu.dot_dimension_numbers<[1], [0], [0], [1], [0, 0, 1, 1], [], []>} : vector<16x8xf32>, vector<8x316xf32>, vector<16x316xf32> -> vector<16x316xf32>
    %71 = arith.addf %66, %70 : vector<16x316xf32>
    %c3_48 = arith.constant 3 : index
    %c0_49 = arith.constant 0 : index
    %c0_50 = arith.constant 0 : index
    %72 = vector.load %arg4[%c3_48, %c0_49, %c0_50] : memref<9x16x8xf32, #tpu.memory_space<vmem>>, vector<1x16x8xf32>
    %73 = vector.shape_cast %72 : vector<1x16x8xf32> to vector<16x8xf32>
    %74 = vector.extract_strided_slice %55 {offsets = [0, 20], sizes = [8, 316], strides = [1, 1]} : vector<8x358xf32> to vector<8x316xf32>
    %cst_51 = arith.constant dense<0.000000e+00> : vector<16x316xf32>
    %75 = tpu.matmul %73, %74, %cst_51 {dimension_numbers = #tpu.dot_dimension_numbers<[1], [0], [0], [1], [0, 0, 1, 1], [], []>} : vector<16x8xf32>, vector<8x316xf32>, vector<16x316xf32> -> vector<16x316xf32>
    %76 = arith.addf %71, %75 : vector<16x316xf32>
    %c4_52 = arith.constant 4 : index
    %c0_53 = arith.constant 0 : index
    %c0_54 = arith.constant 0 : index
    %77 = vector.load %arg4[%c4_52, %c0_53, %c0_54] : memref<9x16x8xf32, #tpu.memory_space<vmem>>, vector<1x16x8xf32>
    %78 = vector.shape_cast %77 : vector<1x16x8xf32> to vector<16x8xf32>
    %79 = vector.extract_strided_slice %55 {offsets = [0, 21], sizes = [8, 316], strides = [1, 1]} : vector<8x358xf32> to vector<8x316xf32>
    %cst_55 = arith.constant dense<0.000000e+00> : vector<16x316xf32>
    %80 = tpu.matmul %78, %79, %cst_55 {dimension_numbers = #tpu.dot_dimension_numbers<[1], [0], [0], [1], [0, 0, 1, 1], [], []>} : vector<16x8xf32>, vector<8x316xf32>, vector<16x316xf32> -> vector<16x316xf32>
    %81 = arith.addf %76, %80 : vector<16x316xf32>
    %c5_56 = arith.constant 5 : index
    %c0_57 = arith.constant 0 : index
    %c0_58 = arith.constant 0 : index
    %82 = vector.load %arg4[%c5_56, %c0_57, %c0_58] : memref<9x16x8xf32, #tpu.memory_space<vmem>>, vector<1x16x8xf32>
    %83 = vector.shape_cast %82 : vector<1x16x8xf32> to vector<16x8xf32>
    %84 = vector.extract_strided_slice %55 {offsets = [0, 22], sizes = [8, 316], strides = [1, 1]} : vector<8x358xf32> to vector<8x316xf32>
    %cst_59 = arith.constant dense<0.000000e+00> : vector<16x316xf32>
    %85 = tpu.matmul %83, %84, %cst_59 {dimension_numbers = #tpu.dot_dimension_numbers<[1], [0], [0], [1], [0, 0, 1, 1], [], []>} : vector<16x8xf32>, vector<8x316xf32>, vector<16x316xf32> -> vector<16x316xf32>
    %86 = arith.addf %81, %85 : vector<16x316xf32>
    %c6_60 = arith.constant 6 : index
    %c0_61 = arith.constant 0 : index
    %c0_62 = arith.constant 0 : index
    %87 = vector.load %arg4[%c6_60, %c0_61, %c0_62] : memref<9x16x8xf32, #tpu.memory_space<vmem>>, vector<1x16x8xf32>
    %88 = vector.shape_cast %87 : vector<1x16x8xf32> to vector<16x8xf32>
    %89 = vector.extract_strided_slice %55 {offsets = [0, 40], sizes = [8, 316], strides = [1, 1]} : vector<8x358xf32> to vector<8x316xf32>
    %cst_63 = arith.constant dense<0.000000e+00> : vector<16x316xf32>
    %90 = tpu.matmul %88, %89, %cst_63 {dimension_numbers = #tpu.dot_dimension_numbers<[1], [0], [0], [1], [0, 0, 1, 1], [], []>} : vector<16x8xf32>, vector<8x316xf32>, vector<16x316xf32> -> vector<16x316xf32>
    %91 = arith.addf %86, %90 : vector<16x316xf32>
    %c7_64 = arith.constant 7 : index
    %c0_65 = arith.constant 0 : index
    %c0_66 = arith.constant 0 : index
    %92 = vector.load %arg4[%c7_64, %c0_65, %c0_66] : memref<9x16x8xf32, #tpu.memory_space<vmem>>, vector<1x16x8xf32>
    %93 = vector.shape_cast %92 : vector<1x16x8xf32> to vector<16x8xf32>
    %94 = vector.extract_strided_slice %55 {offsets = [0, 41], sizes = [8, 316], strides = [1, 1]} : vector<8x358xf32> to vector<8x316xf32>
    %cst_67 = arith.constant dense<0.000000e+00> : vector<16x316xf32>
    %95 = tpu.matmul %93, %94, %cst_67 {dimension_numbers = #tpu.dot_dimension_numbers<[1], [0], [0], [1], [0, 0, 1, 1], [], []>} : vector<16x8xf32>, vector<8x316xf32>, vector<16x316xf32> -> vector<16x316xf32>
    %96 = arith.addf %91, %95 : vector<16x316xf32>
    %c8_68 = arith.constant 8 : index
    %c0_69 = arith.constant 0 : index
    %c0_70 = arith.constant 0 : index
    %97 = vector.load %arg4[%c8_68, %c0_69, %c0_70] : memref<9x16x8xf32, #tpu.memory_space<vmem>>, vector<1x16x8xf32>
    %98 = vector.shape_cast %97 : vector<1x16x8xf32> to vector<16x8xf32>
    %99 = vector.extract_strided_slice %55 {offsets = [0, 42], sizes = [8, 316], strides = [1, 1]} : vector<8x358xf32> to vector<8x316xf32>
    %cst_71 = arith.constant dense<0.000000e+00> : vector<16x316xf32>
    %100 = tpu.matmul %98, %99, %cst_71 {dimension_numbers = #tpu.dot_dimension_numbers<[1], [0], [0], [1], [0, 0, 1, 1], [], []>} : vector<16x8xf32>, vector<8x316xf32>, vector<16x316xf32> -> vector<16x316xf32>
    %101 = arith.addf %96, %100 : vector<16x316xf32>
    %c0_72 = arith.constant 0 : index
    %c0_73 = arith.constant 0 : index
    %102 = vector.load %arg5[%c0_72, %c0_73] : memref<16x1xf32, #tpu.memory_space<vmem>>, vector<16x1xf32>
    %103 = vector.broadcast %102 : vector<16x1xf32> to vector<16x316xf32>
    %104 = arith.addf %101, %103 : vector<16x316xf32>
    %cst_74 = arith.constant 0.000000e+00 : f32
    %105 = vector.broadcast %cst_74 : f32 to vector<16x316xf32>
    %106 = arith.maximumf %104, %105 : vector<16x316xf32>
    %c0_75 = arith.constant 0 : index
    %c0_76 = arith.constant 0 : index
    %107 = vector.load %arg13[%c0_75, %c0_76] : memref<1x316xf32, #tpu.memory_space<vmem>>, vector<1x316xf32>
    %108 = vector.broadcast %107 : vector<1x316xf32> to vector<16x316xf32>
    %109 = arith.mulf %106, %108 : vector<16x316xf32>
    %cst_77 = arith.constant dense<0.000000e+00> : vector<16xf32>
    %110 = vector.multi_reduction <add>, %109, %cst_77 [1] : vector<16x316xf32> to vector<16xf32>
    %111 = vector.shape_cast %110 : vector<16xf32> to vector<16x1xf32>
    %c0_78 = arith.constant 0 : index
    %c0_79 = arith.constant 0 : index
    %112 = vector.load %arg6[%c0_78, %c0_79] : memref<32x16xf32, #tpu.memory_space<vmem>>, vector<32x16xf32>
    %cst_80 = arith.constant dense<0.000000e+00> : vector<32x1xf32>
    %113 = tpu.matmul %112, %111, %cst_80 {dimension_numbers = #tpu.dot_dimension_numbers<[1], [0], [0], [1], [0, 0, 1, 1], [], []>} : vector<32x16xf32>, vector<16x1xf32>, vector<32x1xf32> -> vector<32x1xf32>
    %c0_81 = arith.constant 0 : index
    %c0_82 = arith.constant 0 : index
    %114 = vector.load %arg7[%c0_81, %c0_82] : memref<32x1xf32, #tpu.memory_space<vmem>>, vector<32x1xf32>
    %115 = arith.addf %113, %114 : vector<32x1xf32>
    %cst_83 = arith.constant 0.000000e+00 : f32
    %116 = vector.broadcast %cst_83 : f32 to vector<32x1xf32>
    %117 = arith.maximumf %115, %116 : vector<32x1xf32>
    %c0_84 = arith.constant 0 : index
    %c0_85 = arith.constant 0 : index
    %118 = vector.load %arg8[%c0_84, %c0_85] : memref<32x32xf32, #tpu.memory_space<vmem>>, vector<32x32xf32>
    %cst_86 = arith.constant dense<0.000000e+00> : vector<32x1xf32>
    %119 = tpu.matmul %118, %117, %cst_86 {dimension_numbers = #tpu.dot_dimension_numbers<[1], [0], [0], [1], [0, 0, 1, 1], [], []>} : vector<32x32xf32>, vector<32x1xf32>, vector<32x1xf32> -> vector<32x1xf32>
    %c0_87 = arith.constant 0 : index
    %c0_88 = arith.constant 0 : index
    %120 = vector.load %arg9[%c0_87, %c0_88] : memref<32x1xf32, #tpu.memory_space<vmem>>, vector<32x1xf32>
    %121 = arith.addf %119, %120 : vector<32x1xf32>
    %cst_89 = arith.constant 0.000000e+00 : f32
    %122 = vector.broadcast %cst_89 : f32 to vector<32x1xf32>
    %123 = arith.maximumf %121, %122 : vector<32x1xf32>
    %c0_90 = arith.constant 0 : index
    %c0_91 = arith.constant 0 : index
    %124 = vector.load %arg10[%c0_90, %c0_91] : memref<8x32xf32, #tpu.memory_space<vmem>>, vector<8x32xf32>
    %cst_92 = arith.constant dense<0.000000e+00> : vector<8x1xf32>
    %125 = tpu.matmul %124, %123, %cst_92 {dimension_numbers = #tpu.dot_dimension_numbers<[1], [0], [0], [1], [0, 0, 1, 1], [], []>} : vector<8x32xf32>, vector<32x1xf32>, vector<8x1xf32> -> vector<8x1xf32>
    %c0_93 = arith.constant 0 : index
    %c0_94 = arith.constant 0 : index
    %126 = vector.load %arg11[%c0_93, %c0_94] : memref<8x1xf32, #tpu.memory_space<vmem>>, vector<8x1xf32>
    %127 = arith.addf %125, %126 : vector<8x1xf32>
    %128 = vector.shape_cast %127 : vector<8x1xf32> to vector<1x8x1xf32>
    %c0_95 = arith.constant 0 : index
    %c0_96 = arith.constant 0 : index
    %c0_97 = arith.constant 0 : index
    %129 = vector.load %arg14[%c0_95, %c0_96, %c0_97] : memref<1x8x1xf32, #tpu.memory_space<vmem>>, vector<1x8x1xf32>
    tpu.vector_store %arg14[%c0_95, %c0_96, %c0_97], %128 {strides = array<i32>} : memref<1x8x1xf32, #tpu.memory_space<vmem>>, vector<1x8x1xf32>,
    return
  }
  func.func @transform_0(%arg0: i32) -> (i32, i32, i32) {
    %c0_i32 = arith.constant 0 : i32
    %c0_i32_0 = arith.constant 0 : i32
    %c0_i32_1 = arith.constant 0 : i32
    return %arg0, %c0_i32, %c0_i32_0 : i32, i32, i32
  }
  func.func @transform_1(%arg0: i32) -> (i32, i32, i32) {
    %c0_i32 = arith.constant 0 : i32
    %c0_i32_0 = arith.constant 0 : i32
    %c0_i32_1 = arith.constant 0 : i32
    %c0_i32_2 = arith.constant 0 : i32
    return %c0_i32, %c0_i32_0, %c0_i32_1 : i32, i32, i32
  }
  func.func @transform_2(%arg0: i32) -> (i32, i32) {
    %c0_i32 = arith.constant 0 : i32
    %c0_i32_0 = arith.constant 0 : i32
    %c0_i32_1 = arith.constant 0 : i32
    return %c0_i32, %c0_i32_0 : i32, i32
  }
  func.func @transform_3(%arg0: i32) -> (i32, i32, i32) {
    %c0_i32 = arith.constant 0 : i32
    %c0_i32_0 = arith.constant 0 : i32
    %c0_i32_1 = arith.constant 0 : i32
    %c0_i32_2 = arith.constant 0 : i32
    return %c0_i32, %c0_i32_0, %c0_i32_1 : i32, i32, i32
  }
  func.func @transform_4(%arg0: i32) -> (i32, i32) {
    %c0_i32 = arith.constant 0 : i32
    %c0_i32_0 = arith.constant 0 : i32
    %c0_i32_1 = arith.constant 0 : i32
    return %c0_i32, %c0_i32_0 : i32, i32
  }
  func.func @transform_5(%arg0: i32) -> (i32, i32) {
    %c0_i32 = arith.constant 0 : i32
    %c0_i32_0 = arith.constant 0 : i32
    %c0_i32_1 = arith.constant 0 : i32
    return %c0_i32, %c0_i32_0 : i32, i32
  }
  func.func @transform_6(%arg0: i32) -> (i32, i32) {
    %c0_i32 = arith.constant 0 : i32
    %c0_i32_0 = arith.constant 0 : i32
    %c0_i32_1 = arith.constant 0 : i32
    return %c0_i32, %c0_i32_0 : i32, i32
  }
  func.func @transform_7(%arg0: i32) -> (i32, i32) {
    %c0_i32 = arith.constant 0 : i32
    %c0_i32_0 = arith.constant 0 : i32
    %c0_i32_1 = arith.constant 0 : i32
    return %c0_i32, %c0_i32_0 : i32, i32
  }
  func.func @transform_8(%arg0: i32) -> (i32, i32) {
    %c0_i32 = arith.constant 0 : i32
    %c0_i32_0 = arith.constant 0 : i32
    %c0_i32_1 = arith.constant 0 : i32
    return %c0_i32, %c0_i32_0 : i32, i32
  }
  func.func @transform_9(%arg0: i32) -> (i32, i32) {
    %c0_i32 = arith.constant 0 : i32
    %c0_i32_0 = arith.constant 0 : i32
    %c0_i32_1 = arith.constant 0 : i32
    return %c0_i32, %c0_i32_0 : i32, i32
  }
  func.func @transform_10(%arg0: i32) -> (i32, i32) {
    %c0_i32 = arith.constant 0 : i32
    %c0_i32_0 = arith.constant 0 : i32
    %c0_i32_1 = arith.constant 0 : i32
    return %c0_i32, %c0_i32_0 : i32, i32
  }
  func.func @transform_11(%arg0: i32) -> (i32, i32) {
    %c0_i32 = arith.constant 0 : i32
    %c0_i32_0 = arith.constant 0 : i32
    %c0_i32_1 = arith.constant 0 : i32
    return %c0_i32, %c0_i32_0 : i32, i32
  }
  func.func @transform_12(%arg0: i32) -> (i32, i32) {
    %c0_i32 = arith.constant 0 : i32
    %c0_i32_0 = arith.constant 0 : i32
    %c0_i32_1 = arith.constant 0 : i32
    return %c0_i32, %c0_i32_0 : i32, i32
  }
  func.func @transform_13(%arg0: i32) -> (i32, i32, i32) {
    %c0_i32 = arith.constant 0 : i32
    %c0_i32_0 = arith.constant 0 : i32
    %c0_i32_1 = arith.constant 0 : i32
    return %arg0, %c0_i32, %c0_i32_0 : i32, i32, i32
  }
}

</mosaic_0001>

<bundles_post_ra>
// kernel: behavior_cloning_forward.1
= control target key start
LH: loop header
LB: loop body
LE: loop exit
PB: predicated region body
PF: predicated region fallthrough
CT: control target
= control target key end

     0   :  { %s4448_s25 = smov 0   ;;  %s4902_s0 = inlined_call_operand.vmem [shape: f32[2,4,400], index: 0, kind: input, shape index: {}]   ;;  %s4903_s1 = inlined_call_operand.vmem [shape: f32[9,8,4], index: 1, kind: input, shape index: {}]   ;;  %s4904_s2 = inlined_call_operand.vmem [shape: f32[8,1], index: 2, kind: input, shape index: {}]   ;;  %s4905_s3 = inlined_call_operand.vmem [shape: f32[9,16,8], index: 3, kind: input, shape index: {}]   ;;  %s4906_s4 = inlined_call_operand.vmem [shape: f32[16,1], index: 4, kind: input, shape index: {}]   ;;  %s4907_s5 = inlined_call_operand.vmem [shape: f32[32,16], index: 5, kind: input, shape index: {}]   ;;  %s4908_s6 = inlined_call_operand.vmem [shape: f32[32,1], index: 6, kind: input, shape index: {}]   ;;  %s4909_s7 = inlined_call_operand.vmem [shape: f32[32,32], index: 7, kind: input, shape index: {}]   ;;  %s4910_s8 = inlined_call_operand.vmem [shape: f32[32,1], index: 8, kind: input, shape index: {}]   ;;  %s4911_s9 = inlined_call_operand.vmem [shape: f32[8,32], index: 9, kind: input, shape index: {}]   ;;  %s4912_s10 = inlined_call_operand.vmem [shape: f32[8,1], index: 10, kind: input, shape index: {}]   ;;  %s4913_s11 = inlined_call_operand.vmem [shape: f32[1,358], index: 11, kind: input, shape index: {}]   ;;  %s4914_s12 = inlined_call_operand.vmem [shape: f32[1,316], index: 12, kind: input, shape index: {}]   ;;  %s4915_s13 = inlined_call_operand.vmem [shape: f32[2,8,1], index: 13, kind: output, shape index: {}]  }
   0x1 LB: > { %s3938_s26 = sadd.s32 4294967295, %s4364_s25   ;;  %p3942_p0 = scmp.ge.s32.totalorder %s4364_s25, 1  ;;  %s4364_s25 = sphi %s4448_s25, %s23_s25  }
   0x2   : > { %p387_p1 = scmp.lt.s32.totalorder %s4364_s25, 3 }
   0x4   : > { %p388_p2 = pnand %p3942_p0, %p387_p1 }
   0x5   : > { %p430_p3 = scmp.lt.s32.totalorder (!%p388_p2), %s3938_s26, 1  ;;  %v4366_v0 = vmov (!%p388_p2), 0.0   ;;  %vm4367_vm0 = vmmov (!%p388_p2), 0   ;;  %s4368_s14 = smov (!%p388_p2), 127   ;;  %v1916_v5 = vld [vmem:[%s4904_s2] sm:$0xff] (!%p388_p2)  ;;  %v4376_v6 = vmov (!%p388_p2), 0  }
   0x6   : > { %391 = sbr.rel (%p388_p2) target bundleno = 1655 (0x677), region = 72  ;;  %4127 = vmatprep.subr.mxu1 (!%p388_p2), %v4366_v0  ;;  %531 = vmatprep.mubr.f32.mxu0 (!%p388_p2), %v4366_v0  ;;  %s4369_s15 = smov (!%p388_p2), 126   ;;  %vm460_vm1 = vcmask (!%p388_p2), 1043456   ;;  %vm453_vm2 = vcmask (!%p388_p2), 1039360   ;;  %v3946_v12 = vld [vmem:[%s4903_s1 + $0x8] sm:$0xff] (!%p388_p2)  ;;  %vm456_vm3 = vcmask (!%p388_p2), 31744  }
   0x7   : > { %4129 = vmatprep.mubr.msk.f32.mxu1 (!%p388_p2), %vm4367_vm0, %v4366_v0  ;;  %s4370_s16 = smov (!%p388_p2), 108   ;;  %s4371_s17 = smov (!%p388_p2), 107   ;;  %4354 = vset.pattern.permute.xlu1 (!%p388_p2), %v4376_v6  ;;  %vm766_vm4 = vcmask (!%p388_p2), 1031168   ;;  %v441_v18 = vld [vmem:[%s4903_s1] sm:$0xff] (!%p388_p2)  ;;  %vm930_vm5 = vcmask (!%p388_p2), 883712   ;;  %v3957_v23 = vld [vmem:[%s4903_s1 + $0x10] sm:$0xff] (!%p388_p2) }
   0x8   : > { %s4372_s18 = smov (!%p388_p2), 106   ;;  %s4373_s19 = smov (!%p388_p2), 88   ;;  %4355 = vset.pattern.permute.xlu0 (!%p388_p2), %v4376_v6  ;;  %v3963_v26 = vld [vmem:[%s4903_s1 + $0x18] sm:$0xff] (!%p388_p2)  ;;  %vm1094_vm6 = vcmask (!%p388_p2), 875520   ;;  %v3969_v28 = vld [vmem:[%s4903_s1 + $0x20] sm:$0xff] (!%p388_p2)  ;;  %v3975_v33 = vld [vmem:[%s4903_s1 + $0x28] sm:$0xff] (!%p388_p2) }
   0x9   : > { %s4374_s20 = smov (!%p388_p2), 87   ;;  %s4375_s21 = smov (!%p388_p2), 86   ;;  %vm1258_vm7 = vcmask (!%p388_p2), 867328   ;;  %vm1425_vm8 = vcmask (!%p388_p2), 719872   ;;  %v3981_v42 = vld [vmem:[%s4903_s1 + $0x30] sm:$0xff] (!%p388_p2)  ;;  %vm1592_vm9 = vcmask (!%p388_p2), 711680  }
   0xa   : > { %v3987_v50 = vld [vmem:[%s4903_s1 + $0x38] sm:$0xff] (!%p388_p2)  ;;  %vm1759_vm10 = vcmask (!%p388_p2), 703488   ;;  %v3993_v56 = vld [vmem:[%s4903_s1 + $0x40] sm:$0xff] (!%p388_p2)  ;;  %vm1967_vm11 = vcmask (!%p388_p2), 64512   ;;  %vm3578_vm12 = vcmask (!%p388_p2), 490496   ;;  %vm3596_vm13 = vcmask (!%p388_p2), 130048  }
   0xb   : > { %vm3706_vm14 = vcmask (!%p388_p2), 261120   ;;  %vm3883_vm15 = vcmask (!%p388_p2), 7168  }
   0xd   : > { %s4917_s26 = smov (!%p430_p3, %s3938_s26), 1 }
   0xe   : > { %s4062_s27 = sshll.u32 %s4917_s26, 4  ;;  %s3945_s24 = sshll.u32 %s4917_s26, 3 }
   0xf   : > { %s434_s30 = scalar_lea.vmem %s4902_s0, %s4062_s27 }
  0x10   : > { %v4466_v1 = vld [vmem:[%s434_s30] sm:$0xff]  ;;  %v440_v3 = vld [vmem:[%s434_s30 + $0x8] sm:$0xff] }
  0x11   : > { %447 = vrot.lane.b32.xlu1 %v4466_v1, %s4368_s14  ;;  %v446_v2 = vcombine.high %v4466_v1, %v4466_v1  ;;  %v1416_v4 = vcombine.high %v440_v3, %v440_v3 }
  0x13   : > { %449 = vrot.lane.b32.xlu0 %v446_v2, %s4368_s14 }
  0x15   : > { %762 = vrot.lane.b32.xlu1 %v446_v2, %s4369_s15 }
  0x17   : > { %451 = vrot.lane.b32.xlu0 %v440_v3, %s4368_s14 }
  0x19   : > { %760 = vrot.lane.b32.xlu1 %v4466_v1, %s4369_s15 }
  0x1b   : > { %764 = vrot.lane.b32.xlu0 %v440_v3, %s4369_s15 }
  0x1d   : > { %928 = vrot.lane.b32.xlu1 %v440_v3, %s4370_s16 }
  0x1f   : > { %926 = vrot.lane.b32.xlu0 %v446_v2, %s4370_s16 }
  0x21   : > { %1090 = vrot.lane.b32.xlu1 %v446_v2, %s4371_s17 }
  0x23   : > { %924 = vrot.lane.b32.xlu0 %v4466_v1, %s4370_s16 }
  0x25   : > { %1088 = vrot.lane.b32.xlu1 %v4466_v1, %s4371_s17 }
  0x27   : > { %1092 = vrot.lane.b32.xlu0 %v440_v3, %s4371_s17 }
  0x29   : > { %1256 = vrot.lane.b32.xlu1 %v440_v3, %s4372_s18 }
  0x2b   : > { %1254 = vrot.lane.b32.xlu0 %v446_v2, %s4372_s18 }
  0x2d   : > { %1419 = vrot.lane.b32.xlu1 %v446_v2, %s4373_s19 }
  0x2f   : > { %1252 = vrot.lane.b32.xlu0 %v4466_v1, %s4372_s18 }
  0x31   : > { %1417 = vrot.lane.b32.xlu1 %v4466_v1, %s4373_s19 }
  0x33   : > { %1421 = vrot.lane.b32.xlu0 %v440_v3, %s4373_s19 }
  0x35   : > { %1586 = vrot.lane.b32.xlu1 %v446_v2, %s4374_s20 }
  0x37   : > { %1423 = vrot.lane.b32.xlu0 %v1416_v4, %s4373_s19 }
  0x39   : > { %1584 = vrot.lane.b32.xlu1 %v4466_v1, %s4374_s20 }
  0x3b   : > { %1588 = vrot.lane.b32.xlu0 %v440_v3, %s4374_s20 }
  0x3d   : > { %1753 = vrot.lane.b32.xlu1 %v446_v2, %s4375_s21 }
  0x3f   : > { %1590 = vrot.lane.b32.xlu0 %v1416_v4, %s4374_s20 }
  0x41   : > { %1757 = vrot.lane.b32.xlu1 %v1416_v4, %s4375_s21 }
  0x43   : > { %1755 = vrot.lane.b32.xlu0 %v440_v3, %s4375_s21 }
  0x45   : > { %1919 = vperm.xlu1 %4354, %v1916_v5  }
  0x47   : > { %1751 = vrot.lane.b32.xlu0 %v4466_v1, %s4375_s21 }
  0x83   : > { %v448_v7 = vpop.permute.xlu1 %447 }
  0x85   : > { %v450_v8 = vpop.permute.xlu0 %449 }
  0x86   : > { %v454_v13 = vsel %vm453_vm2, %v448_v7, %v450_v8 }
  0x87   : > { %v763_v9 = vpop.permute.xlu1 %762 }
  0x89   : > { %v452_v10 = vpop.permute.xlu0 %451 }
  0x8a   : > { %4128 = vmatpush3.msk.msra.mxu1 %vm460_vm1, %v452_v10  ;;  %v455_v11 = vsel %vm453_vm2, %v450_v8, %v452_v10 }
  0x8b   : > { %3947 = vmatprep.subr.msk.mxu0 %vm460_vm1, %v455_v11  ;;  %v761_v14 = vpop.permute.xlu1 %760  ;;  %4130 = vmatmul.mubr.msk.f32.vlgmr.msra.gmra.mrb[0].mxu1 %vm456_vm3, %v3946_v12 }
  0x8c   : > { %3948 = vmatpush1.msk.msra.mxu0 %vm460_vm1, %v454_v13  ;;  %4132 = vmatprep.subr.mxu1 %v4366_v0  ;;  %v767_v20 = vsel %vm766_vm4, %v761_v14, %v763_v9 }
  0x8d   : > { %3949 = vmatmul.mubr.msk.f32.vlgmr.msra.gmra.mrb[0].mxu0 %vm456_vm3, %v3946_v12  ;;  %3952 = vmatprep.subr.msk.mxu0 %vm460_vm1, %v446_v2  ;;  %v765_v15 = vpop.permute.xlu0 %764 }
  0x8e   : > { %3953 = vmatpush1.msk.msra.mxu0 %vm460_vm1, %v4466_v1  ;;  %v768_v16 = vsel %vm766_vm4, %v763_v9, %v765_v15  ;;  %681 = vmatprep.mubr.f32.mxu0 %v4366_v0 }
  0x8f   : > { %4133 = vmatpush3.msk.msra.mxu1 %vm460_vm1, %v440_v3  ;;  %3958 = vmatprep.subr.msk.mxu0 %vm460_vm1, %v768_v16  ;;  %v929_v17 = vpop.permute.xlu1 %928 }
  0x90   : > { %4134 = vmatprep.mubr.msk.f32.mxu1 %vm4367_vm0, %v4366_v0  ;;  %4137 = vmatprep.subr.mxu1 %v4366_v0 }
  0x91   : > { %4135 = vmatmul.mubr.msk.f32.vlgmr.msra.gmra.mrb[2].mxu1 %vm456_vm3, %v441_v18  ;;  %v927_v19 = vpop.permute.xlu0 %926 }
  0x92   : > { %4138 = vmatpush3.msk.msra.mxu1 %vm460_vm1, %v765_v15  ;;  %4139 = vmatprep.mubr.msk.f32.mxu1 %vm4367_vm0, %v4366_v0  ;;  %v932_v22 = vsel %vm930_vm5, %v927_v19, %v929_v17 }
  0x93   : > { %v1091_v21 = vpop.permute.xlu1 %1090  ;;  %4142 = vmatprep.subr.mxu1 %v4366_v0 }
  0x95   : > { %3954 = vmatmul.mubr.msk.f32.vlgmr.msra.gmra.mrb[0].mxu0 %vm456_vm3, %v441_v18  ;;  %v925_v24 = vpop.permute.xlu0 %924  ;;  %4140 = vmatmul.mubr.msk.f32.vlgmr.msra.gmra.mrb[4].mxu1 %vm456_vm3, %v3957_v23 }
  0x96   : > { %3959 = vmatpush1.msk.msra.mxu0 %vm460_vm1, %v767_v20  ;;  %842 = vmatprep.mubr.f32.mxu0 %v4366_v0  ;;  %v931_v29 = vsel %vm930_vm5, %v925_v24, %v927_v19  ;;  %v1930_v19 = vlaneseq }
  0x97   : > { %3964 = vmatprep.subr.msk.mxu0 %vm460_vm1, %v932_v22  ;;  %v1089_v25 = vpop.permute.xlu1 %1088  ;;  %4143 = vmatpush3.msk.msra.mxu1 %vm460_vm1, %v929_v17 }
  0x98   : > { %4144 = vmatprep.mubr.msk.f32.mxu1 %vm4367_vm0, %v4366_v0  ;;  %4147 = vmatprep.subr.mxu1 %v4366_v0  ;;  %v1095_v36 = vsel %vm1094_vm6, %v1089_v25, %v1091_v21  ;;  %v4634_v20 = vshrl.u32 %v1930_v19, 7 }
  0x99   : > { %v1093_v27 = vpop.permute.xlu0 %1092  ;;  %4145 = vmatmul.mubr.msk.f32.vlgmr.msra.gmra.mrb[6].mxu1 %vm456_vm3, %v3963_v26 }
  0x9a   : > { %4148 = vmatpush3.msk.msra.mxu1 %vm460_vm1, %v1093_v27  ;;  %4149 = vmatprep.mubr.msk.f32.mxu1 %vm4367_vm0, %v4366_v0  ;;  %v1096_v31 = vsel %vm1094_vm6, %v1091_v21, %v1093_v27  ;;  %v1940_v24 = vsub.s32 2, %v4634_v20 }
  0x9b   : > { %v1257_v30 = vpop.permute.xlu1 %1256  ;;  %4152 = vmatprep.subr.mxu1 %v4366_v0 }
  0x9d   : > { %3960 = vmatmul.mubr.msk.f32.vlgmr.msra.gmra.mrb[0].mxu0 %vm456_vm3, %v3957_v23  ;;  %v1255_v32 = vpop.permute.xlu0 %1254  ;;  %4150 = vmatmul.mubr.msk.f32.vlgmr.msra.gmra.mrb[8].mxu1 %vm456_vm3, %v3969_v28 }
  0x9e   : > { %3965 = vmatpush1.msk.msra.mxu0 %vm460_vm1, %v931_v29  ;;  %1006 = vmatprep.mubr.f32.mxu0 %v4366_v0  ;;  %v1260_v38 = vsel %vm1258_vm7, %v1255_v32, %v1257_v30 }
  0x9f   : > { %3970 = vmatprep.subr.msk.mxu0 %vm460_vm1, %v1096_v31  ;;  %v1420_v34 = vpop.permute.xlu1 %1419  ;;  %4153 = vmatpush3.msk.msra.mxu1 %vm460_vm1, %v1257_v30 }
  0xa0   : > { %4154 = vmatprep.mubr.msk.f32.mxu1 %vm4367_vm0, %v4366_v0  ;;  %4157 = vmatprep.subr.mxu1 %v4366_v0 }
  0xa1   : > { %v1253_v35 = vpop.permute.xlu0 %1252  ;;  %4155 = vmatmul.mubr.msk.f32.vlgmr.msra.gmra.mrb[10].mxu1 %vm456_vm3, %v3975_v33 }
  0xa2   : > { %4159 = vmatprep.mubr.msk.f32.mxu1 %vm4367_vm0, %v4366_v0  ;;  %v1259_v44 = vsel %vm1258_vm7, %v1253_v35, %v1255_v32 }
  0xa3   : > { %v1418_v37 = vpop.permute.xlu1 %1417 }
  0xa4   : > { %v1426_v52 = vsel %vm1425_vm8, %v1418_v37, %v1420_v34 }
  0xa5   : > { %3966 = vmatmul.mubr.msk.f32.vlgmr.msra.gmra.mrb[0].mxu0 %vm456_vm3, %v3963_v26  ;;  %v1422_v39 = vpop.permute.xlu0 %1421  ;;  %v1928_v26 = vld [vmem:[%s4913_s11] sm:$0x7] }
  0xa6   : > { %3971 = vmatpush1.msk.msra.mxu0 %vm460_vm1, %v1095_v36  ;;  %1170 = vmatprep.mubr.f32.mxu0 %v4366_v0  ;;  %v1427_v46 = vsel %vm1425_vm8, %v1420_v34, %v1422_v39  ;;  %v1941_v30 = vrot.slane %v1928_v26, %v1940_v24  ;;  %v1936_v34 = vsub.s32 1, %v4634_v20  ;;  %v1932_v36 = vsub.s32 0, %v4634_v20 }
  0xa7   : > { %3976 = vmatprep.subr.msk.mxu0 %vm460_vm1, %v1260_v38  ;;  %v1587_v40 = vpop.permute.xlu1 %1586 }
  0xa9   : > { %v1424_v41 = vpop.permute.xlu0 %1423 }
  0xaa   : > { %v1428_v43 = vsel %vm1425_vm8, %v1422_v39, %v1424_v41 }
  0xab   : > { %v1585_v45 = vpop.permute.xlu1 %1584  ;;  %4158 = vmatpush3.msk.msra.mxu1 %vm460_vm1, %v1428_v43 }
  0xac   : > { %4160 = vmatmul.mubr.msk.f32.vlgmr.msra.gmra.mrb[12].mxu1 %vm456_vm3, %v3981_v42  ;;  %4162 = vmatprep.subr.mxu1 %v4366_v0  ;;  %v1593_v58 = vsel %vm1592_vm9, %v1585_v45, %v1587_v40 }
  0xad   : > { %3972 = vmatmul.mubr.msk.f32.vlgmr.msra.gmra.mrb[0].mxu0 %vm456_vm3, %v3969_v28  ;;  %v1589_v47 = vpop.permute.xlu0 %1588  ;;  %4164 = vmatprep.mubr.msk.f32.mxu1 %vm4367_vm0, %v4366_v0 }
  0xae   : > { %3977 = vmatpush1.msk.msra.mxu0 %vm460_vm1, %v1259_v44  ;;  %1334 = vmatprep.mubr.f32.mxu0 %v4366_v0  ;;  %v1594_v54 = vsel %vm1592_vm9, %v1587_v40, %v1589_v47  ;;  %v1937_v40 = vrot.slane %v1928_v26, %v1936_v34 }
  0xaf   : > { %3982 = vmatprep.subr.msk.mxu0 %vm460_vm1, %v1427_v46  ;;  %v1754_v48 = vpop.permute.xlu1 %1753  ;;  %v4657_v46 = vld [vmem:[%s4905_s3] sm:$0xff] }
  0xb1   : > { %v1591_v49 = vpop.permute.xlu0 %1590 }
  0xb2   : > { %v1595_v51 = vsel %vm1592_vm9, %v1589_v47, %v1591_v49  ;;  %v4666_v47 = vld [vmem:[%s4905_s3 + $0x8] sm:$0xff]  ;;  %v3530_v49 = vld [vmem:[%s4906_s4] sm:$0xff] }
  0xb3   : > { %4163 = vmatpush3.msk.msra.mxu1 %vm460_vm1, %v1595_v51  ;;  %v1758_v53 = vpop.permute.xlu1 %1757 }
  0xb4   : > { %4165 = vmatmul.mubr.msk.f32.vlgmr.msra.gmra.mrb[14].mxu1 %vm456_vm3, %v3987_v50  ;;  %4167 = vmatprep.subr.mxu1 %v4366_v0 }
  0xb5   : > { %3978 = vmatmul.mubr.msk.f32.vlgmr.msra.gmra.mrb[0].mxu0 %vm456_vm3, %v3975_v33  ;;  %v1756_v55 = vpop.permute.xlu0 %1755  ;;  %4169 = vmatprep.mubr.msk.f32.mxu1 %vm4367_vm0, %v4366_v0 }
  0xb6   : > { %3983 = vmatpush1.msk.msra.mxu0 %vm460_vm1, %v1426_v52  ;;  %v1762_v57 = vsel %vm1759_vm10, %v1756_v55, %v1758_v53  ;;  %1502 = vmatprep.mubr.f32.mxu0 %v4366_v0  ;;  %v1761_v59 = vsel %vm1759_vm10, %v1754_v48, %v1756_v55 }
  0xb7   : > { %3988 = vmatprep.subr.msk.mxu0 %vm460_vm1, %v1594_v54  ;;  %4168 = vmatpush3.msk.msra.mxu1 %vm460_vm1, %v1762_v57 }
  0xb8   : > { %4170 = vmatmul.mubr.msk.f32.vlgmr.msra.gmra.mrb[16].mxu1 %vm456_vm3, %v3993_v56 }
  0xb9   : > { %2038 = vmatprep.mubr.f32.mxu1 %v4366_v0  ;;  %v1752_v60 = vpop.permute.xlu0 %1751 }
  0xba   : > { %v1760_v61 = vsel %vm1759_vm10, %v1752_v60, %v1754_v48  ;;  %v3531_v48 = vld [vmem:[%s4906_s4 + $0x8] sm:$0xff]  ;;  %v4000_v60 = vld [vmem:[%s4905_s3 + $0x18] sm:$0xff] }
  0xbd   : > { %3984 = vmatmul.mubr.msk.f32.vlgmr.msra.gmra.mrb[0].mxu0 %vm456_vm3, %v3981_v42  ;;  %v1933_v42 = vrot.slane %v1928_v26, %v1932_v36  ;;  %v4027_v26 = vld [vmem:[%s4905_s3 + $0x50] sm:$0xff] }
  0xbe   : > { %3989 = vmatpush1.msk.msra.mxu0 %vm460_vm1, %v1593_v58  ;;  %1669 = vmatprep.mubr.f32.mxu0 %v4366_v0 }
  0xbf   : > { %3994 = vmatprep.subr.msk.mxu0 %vm460_vm1, %v1761_v59 }
  0xc4   : > { %v1920_v27 = vpop.permute.xlu1 %1919 }
  0xc5   : > { %3990 = vmatmul.mubr.msk.f32.vlgmr.msra.gmra.mrb[0].mxu0 %vm456_vm3, %v3987_v50 }
  0xc6   : > { %3995 = vmatpush1.msk.msra.mxu0 %vm460_vm1, %v1760_v61  ;;  %1836 = vmatprep.mubr.f32.mxu0 %v4366_v0 }
  0xcd   : > { %3996 = vmatmul.mubr.msk.f32.vlgmr.msra.gmra.mrb[0].mxu0 %vm456_vm3, %v3993_v56  ;;  %v3999_v56 = vld [vmem:[%s4905_s3 + $0x10] sm:$0xff] }
  0xce   : > { %2196 = vmatprep.mubr.f32.mxu0 %v4366_v0 }
 0x15e   : > { %v604_v62 = vpop.f32.mrb[0].mxu1 }
 0x15f   : > { %v4131_v63 = vpop.f32.mrb[1].mxu1 }
 0x164   : > { %v754_v1 = vpop.f32.mrb[2].mxu1 }
 0x165   : > { %v755_v2 = vadd.f32 %v754_v1, %v604_v62  ;;  %v4136_v3 = vpop.f32.mrb[3].mxu1  ;;  %v4009_v62 = vld [vmem:[%s4905_s3 + $0x20] sm:$0xff] }
 0x168   : > { %v915_v4 = vpop.f32.mrb[4].mxu1 }
 0x169   : > { %v921_v5 = vadd.f32 %v915_v4, %v755_v2  ;;  %v4141_v6 = vpop.f32.mrb[5].mxu1  ;;  %v4010_v4 = vld [vmem:[%s4905_s3 + $0x28] sm:$0xff] }
 0x16c   : > { %v1079_v7 = vpop.f32.mrb[6].mxu1 }
 0x16d   : > { %v1085_v8 = vadd.f32 %v1079_v7, %v921_v5  ;;  %v4146_v9 = vpop.f32.mrb[7].mxu1 }
 0x170   : > { %v1243_v10 = vpop.f32.mrb[8].mxu1 }
 0x171   : > { %v1249_v11 = vadd.f32 %v1243_v10, %v1085_v8  ;;  %v4151_v12 = vpop.f32.mrb[9].mxu1  ;;  %v4015_v8 = vld [vmem:[%s4905_s3 + $0x30] sm:$0xff] }
 0x172   : > { %v4016_v12 = vld [vmem:[%s4905_s3 + $0x38] sm:$0xff] }
 0x174   : > { %v1407_v13 = vpop.f32.mrb[10].mxu1 }
 0x175   : > { %v1413_v14 = vadd.f32 %v1407_v13, %v1249_v11  ;;  %v4156_v15 = vpop.f32.mrb[11].mxu1 }
 0x17f   : > { %v1575_v16 = vpop.f32.mrb[12].mxu1 }
 0x180   : > { %v1581_v17 = vadd.f32 %v1575_v16, %v1413_v14  ;;  %v4161_v18 = vpop.f32.mrb[13].mxu1 }
 0x187   : > { %v1742_v21 = vpop.f32.mrb[14].mxu1 }
 0x188   : > { %v1748_v22 = vadd.f32 %v1742_v21, %v1581_v17  ;;  %v4166_v23 = vpop.f32.mrb[15].mxu1  ;;  %v4021_v17 = vld [vmem:[%s4905_s3 + $0x40] sm:$0xff]  ;;  %v4022_v21 = vld [vmem:[%s4905_s3 + $0x48] sm:$0xff] }
 0x18b   : > { %v1909_v25 = vpop.f32.mrb[16].mxu1 }
 0x18c   : > { %v1915_v28 = vadd.f32 %v1909_v25, %v1748_v22  ;;  %v4171_v29 = vpop.f32.mrb[17].mxu1 }
 0x18e   : > { %v1924_v31 = vadd.f32 %v1920_v27, %v1915_v28 }
 0x190   : > { %v1927_v32 = vmax.f32 %v1924_v31, 0.0  ;;  %v4028_v31 = vld [vmem:[%s4905_s3 + $0x58] sm:$0xff] }
 0x192   : > { %v4642_v33 = vmul.f32 %v1941_v30, %v1927_v32 }
 0x194   : > { %1960 = vrot.lane.b32.xlu1 %v4642_v33, %s4368_s14 }
 0x1a0   : > { %v1838_v35 = vpop.f32.mrb[0].mxu0 }
 0x1a1   : > { %v1922_v37 = vadd.f32 %v1920_v27, %v1838_v35  ;;  %v1840_v38 = vpop.f32.mrb[1].mxu0 }
 0x1a2   : > { %v1923_v39 = vadd.f32 %v1920_v27, %v1840_v38 }
 0x1a3   : > { %v1925_v41 = vmax.f32 %v1922_v37, 0.0 }
 0x1a4   : > { %v1926_v43 = vmax.f32 %v1923_v39, 0.0 }
 0x1a5   : > { %v1945_v45 = vmul.f32 %v1933_v42, %v1925_v41  ;;  %v4039_v42 = vld [vmem:[%s4905_s3 + $0x70] sm:$0xff] }
 0x1a6   : > { %v1946_v44 = vmul.f32 %v1937_v40, %v1926_v43  ;;  %v4034_v40 = vld [vmem:[%s4905_s3 + $0x68] sm:$0xff] }
 0x1a8   : > { %2289 = vrot.lane.b32.xlu1 %v1946_v44, %s4369_s15  ;;  %1958 = vrot.lane.b32.xlu0 %v1946_v44, %s4368_s14 }
 0x1a9   : > { %2132 = vmatprep.subr.mxu0 %v1946_v44 }
 0x1aa   : > { %2133 = vmatpush1.msra.mxu0 %v1945_v45 }
 0x1ab   : > { %4005 = vmatmul.mubr.msk.f32.vlgmr.msra.gmra.mrb[2].mxu0 %vm1967_vm11, %v4657_v46 }
 0x1ac   : > { %2287 = vrot.lane.b32.xlu1 %v1945_v45, %s4369_s15  ;;  %1956 = vrot.lane.b32.xlu0 %v1945_v45, %s4368_s14 }
 0x1ad   : > { %2202 = vmatprep.mubr.f32.mxu0 %v4366_v0 }
 0x1af   : > { %4006 = vmatmul.mubr.msk.f32.gmra.mrb[4].mxu0 %vm1967_vm11, %v4666_v47 }
 0x1b0   : > { %2469 = vrot.lane.b32.xlu1 %v4642_v33, %s4370_s16  ;;  %2291 = vrot.lane.b32.xlu0 %v4642_v33, %s4369_s15 }
 0x1b1   : > { %2368 = vmatprep.mubr.f32.mxu0 %v4366_v0 }
 0x1b4   : > { %2645 = vrot.lane.b32.xlu1 %v1946_v44, %s4371_s17  ;;  %2467 = vrot.lane.b32.xlu0 %v1946_v44, %s4370_s16 }
 0x1b8   : > { %2643 = vrot.lane.b32.xlu1 %v1945_v45, %s4371_s17  ;;  %2465 = vrot.lane.b32.xlu0 %v1945_v45, %s4370_s16  ;;  %s438_s16 = scalar_lea.vmem %s4915_s13, %s3945_s24 }
 0x1bc   : > { %2825 = vrot.lane.b32.xlu1 %v4642_v33, %s4372_s18  ;;  %2647 = vrot.lane.b32.xlu0 %v4642_v33, %s4371_s17 }
 0x1c0   : > { %3001 = vrot.lane.b32.xlu1 %v1946_v44, %s4373_s19  ;;  %2823 = vrot.lane.b32.xlu0 %v1946_v44, %s4372_s18 }
 0x1c4   : > { %2999 = vrot.lane.b32.xlu1 %v1945_v45, %s4373_s19  ;;  %2821 = vrot.lane.b32.xlu0 %v1945_v45, %s4372_s18 }
 0x1c8   : > { %3181 = vrot.lane.b32.xlu1 %v4642_v33, %s4374_s20  ;;  %3003 = vrot.lane.b32.xlu0 %v4642_v33, %s4373_s19 }
 0x1cc   : > { %3357 = vrot.lane.b32.xlu1 %v1946_v44, %s4375_s21  ;;  %3179 = vrot.lane.b32.xlu0 %v1946_v44, %s4374_s20  ;;  %v4040_v44 = vld [vmem:[%s4905_s3 + $0x78] sm:$0xff] }
 0x1d0   : > { %3355 = vrot.lane.b32.xlu1 %v1945_v45, %s4375_s21  ;;  %3177 = vrot.lane.b32.xlu0 %v1945_v45, %s4374_s20  ;;  %v4045_v45 = vld [vmem:[%s4905_s3 + $0x80] sm:$0xff] }
 0x1d4   : > { %3539 = vperm.xlu1 %4354, %v3531_v48   ;;  %3359 = vrot.lane.b32.xlu0 %v4642_v33, %s4375_s21 }
 0x1d8   : > { %3534 = vperm.xlu0 %4355, %v3530_v49  }
 0x206   : > { %v1961_v50 = vpop.permute.xlu1 %1960 }
 0x21a   : > { %v2290_v51 = vpop.permute.xlu1 %2289  ;;  %v1959_v52 = vpop.permute.xlu0 %1958 }
 0x21b   : > { %v1963_v53 = vsel %vm453_vm2, %v1959_v52, %v1961_v50 }
 0x21c   : > { %1974 = vmatprep.subr.mxu1 %v1963_v53  ;;  %v3554_v53 = vld [vmem:[%s4914_s12] sm:$0x7] }
 0x21e   : > { %v2288_v54 = vpop.permute.xlu1 %2287  ;;  %v1957_v55 = vpop.permute.xlu0 %1956 }
 0x21f   : > { %v1962_v57 = vsel %vm453_vm2, %v1957_v55, %v1959_v52  ;;  %v2293_v63 = vsel %vm766_vm4, %v2288_v54, %v2290_v51 }
 0x220   : > { %1975 = vmatpush1.msra.mxu1 %v1962_v57 }
 0x221   : > { %4001 = vmatmul.mubr.msk.f32.vlgmr.msra.gmra.mrb[18].mxu1 %vm1967_vm11, %v3999_v56  ;;  %4172 = vmatprep.subr.mxu1 %v1961_v50 }
 0x222   : > { %v2470_v58 = vpop.permute.xlu1 %2469  ;;  %4173 = vmatpush3.msra.mxu1 %v1961_v50  ;;  %v2292_v59 = vpop.permute.xlu0 %2291  ;;  %2044 = vmatprep.mubr.f32.mxu1 %v4366_v0 }
 0x223   : > { %4177 = vmatprep.subr.mxu1 %v4642_v33  ;;  %v2294_v61 = vsel %vm766_vm4, %v2290_v51, %v2292_v59 }
 0x224   : > { %2304 = vmatprep.subr.mxu0 %v2294_v61  ;;  %v3563_v61 = vrot.slane %v3554_v53, %v1936_v34  ;;  %v3567_v34 = vrot.slane %v3554_v53, %v1940_v24 }
 0x225   : > { %4002 = vmatmul.mubr.msk.f32.gmra.mrb[20].mxu1 %vm1967_vm11, %v4000_v60  ;;  %2305 = vmatpush1.msra.mxu0 %v2293_v63 }
 0x226   : > { %v2646_v1 = vpop.permute.xlu1 %2645  ;;  %v2468_v2 = vpop.permute.xlu0 %2467  ;;  %4011 = vmatmul.mubr.msk.f32.vlgmr.msra.gmra.mrb[2].mxu0 %vm1967_vm11, %v4009_v62  ;;  %4174 = vmatprep.mubr.msk.f32.mxu1 %vm1967_vm11, %v3999_v56 }
 0x227   : > { %v2472_v3 = vsel %vm930_vm5, %v2468_v2, %v2470_v58  ;;  %2374 = vmatprep.mubr.f32.mxu0 %v4366_v0 }
 0x228   : > { %2482 = vmatprep.subr.mxu0 %v2472_v3 }
 0x229   : > { %4175 = vmatmul.mubr.msk.f32.vlgmr.msra.gmra.mrb[22].mxu1 %vm1967_vm11, %v4000_v60 }
 0x22a   : > { %4178 = vmatpush3.msra.mxu1 %v4642_v33  ;;  %v2644_v5 = vpop.permute.xlu1 %2643  ;;  %v2466_v6 = vpop.permute.xlu0 %2465  ;;  %4012 = vmatmul.mubr.msk.f32.gmra.mrb[4].mxu0 %vm1967_vm11, %v4010_v4  ;;  %v4033_v33 = vld [vmem:[%s4905_s3 + $0x60] sm:$0xff] }
 0x22b   : > { %4182 = vmatprep.subr.mxu1 %v2292_v59  ;;  %v2471_v7 = vsel %vm930_vm5, %v2466_v6, %v2468_v2  ;;  %2546 = vmatprep.mubr.f32.mxu0 %v4366_v0  ;;  %v2649_v13 = vsel %vm1094_vm6, %v2644_v5, %v2646_v1 }
 0x22c   : > { %2483 = vmatpush1.msra.mxu0 %v2471_v7  ;;  %4179 = vmatprep.mubr.msk.f32.mxu1 %vm1967_vm11, %v4657_v46  ;;  %v4046_v46 = vld [vmem:[%s4905_s3 + $0x88] sm:$0xff] }
 0x22e   : > { %v4738_v9 = vpop.permute.xlu1 %2825  ;;  %v2648_v10 = vpop.permute.xlu0 %2647  ;;  %4017 = vmatmul.mubr.msk.f32.vlgmr.msra.gmra.mrb[2].mxu0 %vm1967_vm11, %v4015_v8 }
 0x22f   : > { %v2650_v11 = vsel %vm1094_vm6, %v2646_v1, %v2648_v10  ;;  %2552 = vmatprep.mubr.f32.mxu0 %v4366_v0 }
 0x230   : > { %2660 = vmatprep.subr.mxu0 %v2650_v11 }
 0x231   : > { %4180 = vmatmul.mubr.msk.f32.vlgmr.msra.gmra.mrb[22].mxu1 %vm1967_vm11, %v4666_v47  ;;  %2661 = vmatpush1.msra.mxu0 %v2649_v13 }
 0x232   : > { %4183 = vmatpush3.msra.mxu1 %v2292_v59  ;;  %v3002_v14 = vpop.permute.xlu1 %3001  ;;  %v2824_v15 = vpop.permute.xlu0 %2823  ;;  %4018 = vmatmul.mubr.msk.f32.gmra.mrb[4].mxu0 %vm1967_vm11, %v4016_v12 }
 0x233   : > { %4187 = vmatprep.subr.mxu1 %v2470_v58  ;;  %v2828_v16 = vsel %vm1258_vm7, %v2824_v15, %v4738_v9  ;;  %2724 = vmatprep.mubr.f32.mxu0 %v4366_v0 }
 0x234   : > { %2838 = vmatprep.subr.mxu0 %v2828_v16  ;;  %4184 = vmatprep.mubr.msk.f32.mxu1 %vm1967_vm11, %v4009_v62 }
 0x236   : > { %v2822_v18 = vpop.permute.xlu0 %2821  ;;  %4023 = vmatmul.mubr.msk.f32.vlgmr.msra.gmra.mrb[2].mxu0 %vm1967_vm11, %v4021_v17  ;;  %v3000_v22 = vpop.permute.xlu1 %2999 }
 0x237   : > { %v2827_v19 = vsel %vm1258_vm7, %v2822_v18, %v2824_v15  ;;  %2730 = vmatprep.mubr.f32.mxu0 %v4366_v0  ;;  %v3005_v27 = vsel %vm1425_vm8, %v3000_v22, %v3002_v14 }
 0x238   : > { %2839 = vmatpush1.msra.mxu0 %v2827_v19 }
 0x239   : > { %4185 = vmatmul.mubr.msk.f32.vlgmr.msra.gmra.mrb[22].mxu1 %vm1967_vm11, %v4010_v4 }
 0x23a   : > { %4188 = vmatpush3.msra.mxu1 %v2470_v58  ;;  %v3004_v23 = vpop.permute.xlu0 %3003  ;;  %4024 = vmatmul.mubr.msk.f32.gmra.mrb[4].mxu0 %vm1967_vm11, %v4022_v21  ;;  %v3182_v28 = vpop.permute.xlu1 %3181  ;;  %v3559_v58 = vrot.slane %v3554_v53, %v1932_v36 }
 0x23b   : > { %4192 = vmatprep.subr.mxu1 %v2648_v10  ;;  %v3006_v25 = vsel %vm1425_vm8, %v3002_v14, %v3004_v23  ;;  %2902 = vmatprep.mubr.f32.mxu0 %v4366_v0 }
 0x23c   : > { %3016 = vmatprep.subr.mxu0 %v3006_v25  ;;  %4189 = vmatprep.mubr.msk.f32.mxu1 %vm1967_vm11, %v4015_v8 }
 0x23e   : > { %v3180_v29 = vpop.permute.xlu0 %3179  ;;  %4029 = vmatmul.mubr.msk.f32.vlgmr.msra.gmra.mrb[2].mxu0 %vm1967_vm11, %v4027_v26  ;;  %v3358_v35 = vpop.permute.xlu1 %3357 }
 0x23f   : > { %3017 = vmatpush1.msra.mxu0 %v3005_v27  ;;  %v3184_v30 = vsel %vm1592_vm9, %v3180_v29, %v3182_v28  ;;  %2908 = vmatprep.mubr.f32.mxu0 %v4366_v0 }
 0x240   : > { %3194 = vmatprep.subr.mxu0 %v3184_v30  ;;  %v3589_v30 = vld [vmem:[%s4907_s5 + $0x8] sm:$0xff] }
 0x241   : > { %4190 = vmatmul.mubr.msk.f32.vlgmr.msra.gmra.mrb[22].mxu1 %vm1967_vm11, %v4016_v12 }
 0x242   : > { %4193 = vmatpush3.msra.mxu1 %v2648_v10  ;;  %v3178_v32 = vpop.permute.xlu0 %3177  ;;  %4030 = vmatmul.mubr.msk.f32.gmra.mrb[4].mxu0 %vm1967_vm11, %v4028_v31  ;;  %v3356_v41 = vpop.permute.xlu1 %3355 }
 0x243   : > { %4197 = vmatprep.subr.mxu1 %v4738_v9  ;;  %3080 = vmatprep.mubr.f32.mxu0 %v4366_v0  ;;  %v3183_v37 = vsel %vm1592_vm9, %v3178_v32, %v3180_v29  ;;  %v3361_v43 = vsel %vm1759_vm10, %v3356_v41, %v3358_v35  ;;  %v3591_v32 = vld [vmem:[%s4907_s5 + $0x18] sm:$0xff] }
 0x244   : > { %4194 = vmatprep.mubr.msk.f32.mxu1 %vm1967_vm11, %v4021_v17 }
 0x246   : > { %v3360_v38 = vpop.permute.xlu0 %3359  ;;  %4035 = vmatmul.mubr.msk.f32.vlgmr.msra.gmra.mrb[2].mxu0 %vm1967_vm11, %v4033_v33 }
 0x247   : > { %3195 = vmatpush1.msra.mxu0 %v3183_v37  ;;  %v3362_v39 = vsel %vm1759_vm10, %v3358_v35, %v3360_v38  ;;  %3086 = vmatprep.mubr.f32.mxu0 %v4366_v0  ;;  %v3593_v35 = vld [vmem:[%s4908_s6 + $0x8] sm:$0xff]  ;;  %v3592_v37 = vld [vmem:[%s4908_s6] sm:$0xff] }
 0x248   : > { %3372 = vmatprep.subr.mxu0 %v3362_v39 }
 0x249   : > { %4195 = vmatmul.mubr.msk.f32.vlgmr.msra.gmra.mrb[22].mxu1 %vm1967_vm11, %v4022_v21 }
 0x24a   : > { %4198 = vmatpush3.msra.mxu1 %v4738_v9  ;;  %4036 = vmatmul.mubr.msk.f32.gmra.mrb[4].mxu0 %vm1967_vm11, %v4034_v40 }
 0x24b   : > { %4202 = vmatprep.subr.mxu1 %v3004_v23  ;;  %3258 = vmatprep.mubr.f32.mxu0 %v4366_v0 }
 0x24c   : > { %4199 = vmatprep.mubr.msk.f32.mxu1 %vm1967_vm11, %v4027_v26 }
 0x24e   : > { %4041 = vmatmul.mubr.msk.f32.vlgmr.msra.gmra.mrb[2].mxu0 %vm1967_vm11, %v4039_v42 }
 0x24f   : > { %3373 = vmatpush1.msra.mxu0 %v3361_v43  ;;  %3264 = vmatprep.mubr.f32.mxu0 %v4366_v0 }
 0x251   : > { %4200 = vmatmul.mubr.msk.f32.vlgmr.msra.gmra.mrb[22].mxu1 %vm1967_vm11, %v4028_v31  ;;  %v3590_v31 = vld [vmem:[%s4907_s5 + $0x10] sm:$0xff] }
 0x252   : > { %4203 = vmatpush3.msra.mxu1 %v3004_v23  ;;  %4042 = vmatmul.mubr.msk.f32.gmra.mrb[4].mxu0 %vm1967_vm11, %v4040_v44 }
 0x253   : > { %4207 = vmatprep.subr.mxu1 %v3182_v28  ;;  %3436 = vmatprep.mubr.f32.mxu0 %v4366_v0  ;;  %v3540_v2 = vpop.permute.xlu1 %3539 }
 0x254   : > { %4204 = vmatprep.mubr.msk.f32.mxu1 %vm1967_vm11, %v4033_v33  ;;  %v3698_v33 = vld [vmem:[%s4909_s7] sm:$0xff] }
 0x256   : > { %4047 = vmatmul.mubr.msk.f32.vlgmr.msra.gmra.mrb[2].mxu0 %vm1967_vm11, %v4045_v45 }
 0x257   : > { %3442 = vmatprep.mubr.f32.mxu0 %v4366_v0  ;;  %v3535_v52 = vpop.permute.xlu0 %3534 }
 0x259   : > { %4205 = vmatmul.mubr.msk.f32.vlgmr.msra.gmra.mrb[22].mxu1 %vm1967_vm11, %v4034_v40 }
 0x25a   : > { %4208 = vmatpush3.msra.mxu1 %v3182_v28  ;;  %4048 = vmatmul.mubr.msk.f32.gmra.mrb[4].mxu0 %vm1967_vm11, %v4046_v46  ;;  %v3588_v28 = vld [vmem:[%s4907_s5] sm:$0xff] }
 0x25b   : > { %4212 = vmatprep.subr.mxu1 %v3360_v38  ;;  %4209 = vmatprep.mubr.msk.f32.mxu1 %vm1967_vm11, %v4039_v42  ;;  %v3595_v42 = vld [vmem:[%s4908_s6 + $0x18] sm:$0xff] }
 0x261   : > { %4210 = vmatmul.mubr.msk.f32.vlgmr.msra.gmra.mrb[22].mxu1 %vm1967_vm11, %v4040_v44  ;;  %v3594_v44 = vld [vmem:[%s4908_s6 + $0x10] sm:$0xff] }
 0x262   : > { %4213 = vmatpush3.msra.mxu1 %v3360_v38  ;;  %4214 = vmatprep.mubr.msk.f32.mxu1 %vm1967_vm11, %v4045_v45 }
 0x269   : > { %4215 = vmatmul.mubr.msk.f32.vlgmr.msra.gmra.mrb[22].mxu1 %vm1967_vm11, %v4046_v46 }
 0x26a   : > { %4221 = vmatprep.mubr.msk.f32.mxu1 %vm3596_vm13, %v3588_v28 }
 0x2f4   : > { %v2040_v47 = vpop.f32.mrb[18].mxu1 }
 0x2f5   : > { %v2042_v48 = vpop.f32.mrb[19].mxu1 }
 0x2f8   : > { %v2046_v49 = vpop.f32.mrb[20].mxu1 }
 0x2f9   : > { %v2048_v50 = vpop.f32.mrb[21].mxu1 }
 0x329   : > { %v3438_v51 = vpop.f32.mrb[2].mxu0 }
 0x32a   : > { %v4270_v54 = vadd.f32 %v3438_v51, %v2040_v47  ;;  %v3440_v55 = vpop.f32.mrb[3].mxu0 }
 0x32b   : > { %v4271_v56 = vadd.f32 %v3440_v55, %v2042_v48  ;;  %v3700_v55 = vld [vmem:[%s4909_s7 + $0x10] sm:$0xff] }
 0x32c   : > { %v3542_v57 = vadd.f32 %v4270_v54, %v3535_v52  ;;  %v3699_v54 = vld [vmem:[%s4909_s7 + $0x8] sm:$0xff] }
 0x32d   : > { %v3543_v59 = vadd.f32 %v4271_v56, %v3535_v52  ;;  %v3444_v60 = vpop.f32.mrb[4].mxu0  ;;  %v3701_v56 = vld [vmem:[%s4909_s7 + $0x18] sm:$0xff] }
 0x32e   : > { %v3548_v62 = vmax.f32 %v3542_v57, 0.0  ;;  %v4272_v63 = vadd.f32 %v3444_v60, %v2046_v49  ;;  %v3446_v1 = vpop.f32.mrb[5].mxu0  ;;  %v4377_v57 = vmov 0.0|0.0  }
 0x32f   : > { %v3549_v3 = vmax.f32 %v3543_v59, 0.0  ;;  %v4273_v4 = vadd.f32 %v3446_v1, %v2048_v50  ;;  %v3702_v59 = vld [vmem:[%s4910_s8] sm:$0xff]  ;;  %v3705_v1 = vld [vmem:[%s4910_s8 + $0x18] sm:$0xff] }
 0x330   : > { %v3545_v5 = vadd.f32 %v4272_v63, %v3540_v2  ;;  %v3571_v6 = vmul.f32 %v3559_v58, %v3548_v62 }
 0x331   : > { %v3546_v7 = vadd.f32 %v4273_v4, %v3540_v2  ;;  %v3572_v8 = vmul.f32 %v3563_v61, %v3549_v3 }
 0x332   : > { %v3551_v9 = vmax.f32 %v3545_v5, 0.0 }
 0x333   : > { %v3552_v10 = vmax.f32 %v3546_v7, 0.0  ;;  %v3577_v11 = vadd.f32 %v3572_v8, %v3571_v6 }
 0x334   : > { %v3574_v12 = vmul.f32 %v3559_v58, %v3551_v9  ;;  %v3703_v58 = vld [vmem:[%s4910_s8 + $0x8] sm:$0xff] }
 0x335   : > { %v3575_v36 = vmul.f32 %v3563_v61, %v3552_v10 }
 0x337   : > { %v3583_v13 = vadd.f32 %v3575_v36, %v3574_v12  ;;  %v3808_v12 = vld [vmem:[%s4911_s9] sm:$0xff] }
 0x338   : > { %v3809_v36 = vld [vmem:[%s4912_s10] sm:$0xff] }
 0x33c   : > { %v4216_v14 = vpop.f32.mrb[22].mxu1 }
 0x33d   : > { %v3547_v15 = vadd.f32 %v4216_v14, %v3540_v2  ;;  %v3515_v16 = vpop.f32.mrb[23].mxu1 }
 0x33e   : > { %v3544_v17 = vadd.f32 %v3535_v52, %v3515_v16 }
 0x33f   : > { %v3553_v18 = vmax.f32 %v3547_v15, 0.0 }
 0x340   : > { %v3550_v19 = vmax.f32 %v3544_v17, 0.0 }
 0x341   : > { %v3576_v21 = vmul.f32 %v3567_v34, %v3553_v18 }
 0x342   : > { %v3573_v22 = vmul.f32 %v3567_v34, %v3550_v19 }
 0x343   : > { %v3584_v23 = vsel %vm3578_vm12, %v3576_v21, 0.0 }
 0x344   : > { %v3585_v25 = vadd.f32 %v3584_v23, %v3583_v13  ;;  %v3579_v26 = vsel %vm3578_vm12, %v3573_v22, 0.0 }
 0x345   : > { %v3580_v27 = vadd.f32 %v3579_v26, %v3577_v11 }
 0x346   : > { %3586 = vadd.xlane.f32.xlu0 %v3585_v25 }
 0x347   : > { %3581 = vadd.xlane.f32.xlu1 %v3580_v27 }
 0x3d3   : > { %v3587_v20 = vpop.xlane.xlu0 %3586 }
 0x3d4   : > { %v3582_v24 = vpop.xlane.xlu1 %3581 }
 0x3d5   : > { %v4252_v29 = vpack.c.bf16 %v3587_v20, %v3582_v24 }
 0x3d7   : > { %4253 = vmatprep.subr.bf16.mxu1 %v4252_v29 }
 0x3d8   : > { %4255 = vmatpush3.bf16.msra.mxu1 %v4252_v29 }
 0x3db   : > { %4222 = vmatmul.mubr.msk.f32.vlgmr.msra.gmra.mrb[24].mxu1 %vm3596_vm13, %v3589_v30 }
 0x3dc   : > { %4224 = vmatprep.mubr.msk.f32.mxu1 %vm3596_vm13, %v3590_v31 }
 0x3df   : > { %4225 = vmatmul.mubr.msk.f32.gmra.mrb[26].mxu1 %vm3596_vm13, %v3591_v32 }
 0x3e0   : > { %4235 = vmatprep.mubr.msk.f32.mxu1 %vm3706_vm14, %v3698_v33 }
 0x4ae   : > { %v4223_v38 = vpop.f32.mrb[24].mxu1 }
 0x4af   : > { %v3681_v39 = vadd.f32 %v4223_v38, %v3593_v35  ;;  %v3675_v40 = vpop.f32.mrb[25].mxu1 }
 0x4b0   : > { %v3676_v41 = vadd.f32 %v3675_v40, %v3592_v37 }
 0x4b1   : > { %v3695_v43 = vmax.f32 %v3681_v39, 0.0 }
 0x4b2   : > { %v3694_v45 = vmax.f32 %v3676_v41, 0.0  ;;  %v4226_v46 = vpop.f32.mrb[26].mxu1 }
 0x4b3   : > { %v3691_v47 = vadd.f32 %v4226_v46, %v3595_v42  ;;  %v3685_v48 = vpop.f32.mrb[27].mxu1 }
 0x4b4   : > { %v4256_v49 = vpack.c.bf16 %v3695_v43, %v3694_v45  ;;  %v3686_v50 = vadd.f32 %v3685_v48, %v3594_v44 }
 0x4b5   : > { %v3697_v51 = vmax.f32 %v3691_v47, 0.0 }
 0x4b6   : > { %v3696_v52 = vmax.f32 %v3686_v50, 0.0  ;;  %4257 = vmatprep.subr.bf16.mxu1 %v4256_v49 }
 0x4b7   : > { %4259 = vmatpush3.bf16.msra.mxu1 %v4256_v49 }
 0x4b8   : > { %v4260_v53 = vpack.c.bf16 %v3697_v51, %v3696_v52 }
 0x4ba   : > { %4261 = vmatprep.subr.bf16.mxu1 %v4260_v53 }
 0x4bb   : > { %4263 = vmatpush3.bf16.msra.mxu1 %v4260_v53 }
 0x4bc   : > { %4264 = vmatprep.subr.bf16.mxu1 %v4377_v57 }
 0x4be   : > { %4236 = vmatmul.mubr.msk.f32.vlgmr.msra.gmra.mrb[28].mxu1 %vm3706_vm14, %v3699_v54 }
 0x4bf   : > { %4238 = vmatprep.mubr.msk.f32.mxu1 %vm3706_vm14, %v3700_v55 }
 0x4c2   : > { %4239 = vmatmul.mubr.msk.f32.gmra.mrb[30].mxu1 %vm3706_vm14, %v3701_v56 }
 0x4c3   : > { %4249 = vmatprep.mubr.msk.f32.mxu1 %vm4367_vm0, %v4366_v0  ;;  %v3704_v0 = vld [vmem:[%s4910_s8 + $0x10] sm:$0xff] }
 0x591   : > { %v4237_v60 = vpop.f32.mrb[28].mxu1 }
 0x592   : > { %v3791_v61 = vadd.f32 %v4237_v60, %v3703_v58  ;;  %v3785_v62 = vpop.f32.mrb[29].mxu1 }
 0x593   : > { %v3786_v63 = vadd.f32 %v3785_v62, %v3702_v59 }
 0x594   : > { %v3805_v2 = vmax.f32 %v3791_v61, 0.0 }
 0x595   : > { %v3804_v3 = vmax.f32 %v3786_v63, 0.0  ;;  %v4240_v4 = vpop.f32.mrb[30].mxu1 }
 0x596   : > { %v3801_v5 = vadd.f32 %v4240_v4, %v3705_v1  ;;  %v3795_v6 = vpop.f32.mrb[31].mxu1 }
 0x597   : > { %v4265_v7 = vpack.c.bf16 %v3805_v2, %v3804_v3  ;;  %v3796_v8 = vadd.f32 %v3795_v6, %v3704_v0 }
 0x598   : > { %v3807_v9 = vmax.f32 %v3801_v5, 0.0 }
 0x599   : > { %v3806_v10 = vmax.f32 %v3796_v8, 0.0  ;;  %4266 = vmatpush3.bf16.msra.mxu1 %v4265_v7 }
 0x59a   : > { %4267 = vmatprep.subr.bf16.mxu1 %v4377_v57 }
 0x59b   : > { %v4268_v11 = vpack.c.bf16 %v3807_v9, %v3806_v10 }
 0x59d   : > { %4269 = vmatpush3.bf16.msra.mxu1 %v4268_v11 }
 0x5a0   : > { %4250 = vmatmul.mubr.msk.f32.vlgmr.msra.gmra.mrb[32].mxu1 %vm3706_vm14, %v3808_v12 }
 0x673   : > { %v3879_v13 = vpop.f32.mrb[32].mxu1 }
 0x674   : > { %v3880_v14 = vadd.f32 %v3879_v13, %v3809_v36  ;;  %v4251_v15 = vpop.f32.mrb[33].mxu1 }
 0x676   : > { %3884 = vst.msk [vmem:[%s438_s16] sm:$0xff] %vm3883_vm15, %v3880_v14 }
 0x677 PF: > { %s23_s25 = sadd.s32 1, %s4364_s25  }
 0x678   : > { %p20_p4 = scmp.ge.s32.totalorder %s23_s25, 4  }
 0x67a   :  { %22 = sbr.rel (!%p20_p4) target bundleno = 1 (0x1), region = 118 }

</bundles_post_ra>
